<compile_context>
chip_gen: v7x
topology: tpu7x:2x2x1
jax: 0.10.0
libtpu: 0.0.40
codegen_flags: <defaults>
</compile_context>

<pallas_src>
import jax
import jax.numpy as jnp
from jax import lax
from jax.experimental import pallas as pl
from jax.experimental.pallas import tpu as pltpu

BF16 = jnp.bfloat16
F32 = jnp.float32


# ---------------------------------------------------------------------------
# Fused kernel: entire network for one batch element per grid step
# ---------------------------------------------------------------------------
def _lenet_kernel(x_ref, b1_ref, bias1_ref, px1_ref,
                  b2_ref, bias2_ref, px2_ref,
                  w1_ref, bfc1_ref, w2_ref, bfc2_ref, w3_ref, bfc3_ref,
                  o_ref):
    # ---- conv1 (5x5, pad 2, 1->6): 5 banded matmuls + bias + ReLU -----------
    acc1 = jnp.zeros((28, 6 * 28), F32)
    for j in range(5):                                          # static unroll
        lhs = x_ref[0, j:j + 28, :].astype(BF16)                # [28, 32]
        acc1 = acc1 + jnp.dot(lhs, b1_ref[j],                   # [32, 168]
                              preferred_element_type=F32)
    h1 = jnp.maximum(acc1 + bias1_ref[...], 0.0)                # [28, 168] f32

    # ---- avg-pool 2x2: x-pooling here; y-pooling folded into conv2 weights --
    s1 = jnp.dot(px1_ref[...], h1.astype(BF16),
                 preferred_element_type=F32)                    # [14, 168] f32

    # ---- conv2 (5x5, valid, 6->16) -------------------------------------------
    acc2 = jnp.zeros((10, 16 * 10), F32)
    for j in range(5):
        lhs = s1[j:j + 10, :].astype(BF16)                      # [10, 168]
        acc2 = acc2 + jnp.dot(lhs, b2_ref[j],                   # [168, 160]
                              preferred_element_type=F32)
    h2 = jnp.maximum(acc2 + bias2_ref[...], 0.0)                # [10, 160] f32

    # ---- avg-pool 2x2: x-pooling here; y-pooling folded into fc1 weights ----
    s2 = jnp.dot(px2_ref[...], h2.astype(BF16),
                 preferred_element_type=F32)                    # [5, 160] f32

    # ---- fc1 + ReLU (NCHW flatten ordering baked into the weight packing) ---
    f1 = jnp.zeros((1, 128), F32)
    for x in range(5):
        f1 = f1 + jnp.dot(s2[x:x + 1, :].astype(BF16), w1_ref[x],
                          preferred_element_type=F32)           # [1, 128]
    f1 = jnp.maximum(f1 + bfc1_ref[...], 0.0)
    # TODO(synk): dropout is the identity here (eval-mode forward).

    # ---- fc2 + ReLU ----------------------------------------------------------
    f2 = jnp.dot(f1.astype(BF16), w2_ref[...], preferred_element_type=F32)
    f2 = jnp.maximum(f2 + bfc2_ref[...], 0.0)                   # [1, 128]

    # ---- fc3 (logits padded to 128 lanes -> lane-dense store) ----------------
    out = jnp.dot(f2.astype(BF16), w3_ref[...], preferred_element_type=F32)
    o_ref[0] = out + bfc3_ref[...]                              # [1, 128]


# ---------------------------------------------------------------------------
# Parameters (PyTorch layout) + one-time repacking into kernel-ready matrices
# ---------------------------------------------------------------------------
def init_raw_params(key):
    ks = jax.random.split(key, 5)
    p = {}
    p["conv1_w"] = 0.1 * jax.random.normal(ks[0], (6, 1, 5, 5), F32)
    p["conv1_b"] = jnp.full((6,), 0.01, F32)
    p["conv2_w"] = 0.1 * jax.random.normal(ks[1], (16, 6, 5, 5), F32)
    p["conv2_b"] = jnp.full((16,), 0.01, F32)
    p["fc1_w"] = 0.05 * jax.random.normal(ks[2], (120, 400), F32)   # [out, in]
    p["fc1_b"] = jnp.full((120,), 0.01, F32)
    p["fc2_w"] = 0.05 * jax.random.normal(ks[3], (84, 120), F32)
    p["fc2_b"] = jnp.full((84,), 0.01, F32)
    p["fc3_w"] = 0.05 * jax.random.normal(ks[4], (10, 84), F32)
    p["fc3_b"] = jnp.full((10,), 0.01, F32)
    return p


def pack_params(raw):
    """One-time repack: banded conv matrices, folded pooling, padded FC weights."""
    # 2x2/stride-2 average-pooling matrices (exact 0.5 factors each).
    px1 = 0.5 * jnp.kron(jnp.eye(14, dtype=F32), jnp.ones((1, 2), F32))    # [14, 28]
    py1 = 0.5 * jnp.kron(jnp.eye(6, dtype=F32),
                         jnp.kron(jnp.eye(14, dtype=F32), jnp.ones((2, 1), F32)))  # [168, 84]
    px2 = 0.5 * jnp.kron(jnp.eye(5, dtype=F32), jnp.ones((1, 2), F32))     # [5, 10]
    py2 = 0.5 * jnp.kron(jnp.eye(16, dtype=F32),
                         jnp.kron(jnp.eye(5, dtype=F32), jnp.ones((2, 1), F32)))   # [160, 80]

    # conv1 -> B1[j][r, oc*28 + y] = w1[oc, 0, r - y, j]  (0 <= r - y < 5)
    w1 = raw["conv1_w"]
    r = jnp.arange(32)[:, None]
    y = jnp.arange(28)[None, :]
    i = r - y
    valid = (i >= 0) & (i < 5)
    w1t = jnp.transpose(w1[:, 0], (1, 2, 0))                    # [i, j, oc]
    vals = w1t[jnp.clip(i, 0, 4)]                               # [32, 28, 5, 6]
    vals = jnp.where(valid[:, :, None, None], vals, 0.0)
    b1 = jnp.transpose(vals, (2, 0, 3, 1)).reshape(5, 32, 6 * 28)          # [5, 32, 168]

    # conv2 -> B2[j][ic*14 + r, oc*10 + y] = w2[oc, ic, r - y, j]; fold py1 in.
    w2 = raw["conv2_w"]
    r = jnp.arange(14)[:, None]
    y = jnp.arange(10)[None, :]
    i = r - y
    valid = (i >= 0) & (i < 5)
    w2p = jnp.transpose(w2, (2, 3, 1, 0))                       # [i, j, ic, oc]
    vals = w2p[jnp.clip(i, 0, 4)]                               # [14, 10, 5, 6, 16]
    vals = jnp.where(valid[:, :, None, None, None], vals, 0.0)
    b2 = jnp.transpose(vals, (2, 3, 0, 4, 1)).reshape(5, 6 * 14, 16 * 10)  # [5, 84, 160]
    b2 = jnp.einsum("ab,jbc->jac", py1, b2)                     # [5, 168, 160]

    # fc1 -> per-x-column [5, 80, 120] (matches torch.flatten(NCHW) ordering),
    # pad out-features 120 -> 128, fold pool2's y-pooling (py2) in.
    w1x = raw["fc1_w"].reshape(120, 16, 5, 5)                   # [n, oc, y, x]
    w1x = jnp.transpose(w1x, (3, 1, 2, 0)).reshape(5, 80, 120)
    w1x = jnp.pad(w1x, ((0, 0), (0, 0), (0, 8)))                # [5, 80, 128]
    wf1 = jnp.einsum("ab,xbn->xan", py2, w1x)                   # [5, 160, 128]

    wf2 = jnp.pad(raw["fc2_w"].T, ((0, 8), (0, 44)))            # [128, 128]
    wf3 = jnp.pad(raw["fc3_w"].T, ((0, 44), (0, 118)))          # [128, 128]

    return {
        "b1": b1.astype(BF16),
        "bias1": jnp.repeat(raw["conv1_b"], 28)[None, :].astype(F32),      # [1, 168]
        "px1": px1.astype(BF16),
        "b2": b2.astype(BF16),
        "bias2": jnp.repeat(raw["conv2_b"], 10)[None, :].astype(F32),      # [1, 160]
        "px2": px2.astype(BF16),
        "wf1": wf1.astype(BF16),
        "bfc1": jnp.pad(raw["fc1_b"], (0, 8))[None, :].astype(F32),        # [1, 128]
        "wf2": wf2.astype(BF16),
        "bfc2": jnp.pad(raw["fc2_b"], (0, 44))[None, :].astype(F32),       # [1, 128]
        "wf3": wf3.astype(BF16),
        "bfc3": jnp.pad(raw["fc3_b"], (0, 118))[None, :].astype(F32),      # [1, 128]
    }


def _const_index_map(ndim):
    return lambda i: (0,) * ndim


# ---------------------------------------------------------------------------
# Forward (single fused pallas_call)
# ---------------------------------------------------------------------------
@jax.jit
def net_forward(x_nchw, packed):
    n = x_nchw.shape[0]
    # Only activation prep outside the kernel: zero-pad (+2) and transpose so
    # sublanes = x, lanes = y.  ~4 KiB per image, no im2col expansion.
    xp = jnp.pad(x_nchw[:, 0], ((0, 0), (2, 2), (2, 2)))        # [N, 32(y), 32(x)]
    xt = jnp.transpose(xp, (0, 2, 1))                           # [N, 32(x), 32(y)]

    weight_order = ["b1", "bias1", "px1", "b2", "bias2", "px2",
                    "wf1", "bfc1", "wf2", "bfc2", "wf3", "bfc3"]
    weights = [packed[k] for k in weight_order]

    in_specs = [pl.BlockSpec((1, 32, 32), lambda i: (i, 0, 0))]
    # Constant index maps -> weight tiles are DMA'd once and stay VMEM-resident.
    in_specs += [pl.BlockSpec(w.shape, _const_index_map(w.ndim)) for w in weights]

    out = pl.pallas_call(
        _lenet_kernel,
        grid=(n,),
        in_specs=in_specs,
        out_specs=pl.BlockSpec((1, 1, 128), lambda i: (i, 0, 0)),
        out_shape=jax.ShapeDtypeStruct((n, 1, 128), F32),
        compiler_params=pltpu.CompilerParams(
            dimension_semantics=("parallel",)),
    )(xt, *weights)
    return out[:, 0, :10]


# ---------------------------------------------------------------------------
# Pure-JAX reference (mirrors the PyTorch module in eval mode)
# ---------------------------------------------------------------------------
def net_forward_ref(x, raw):
    dn1 = lax.conv_dimension_numbers(x.shape, raw["conv1_w"].shape,
                                     ("NCHW", "OIHW", "NCHW"))
    y = lax.conv_general_dilated(x, raw["conv1_w"], (1, 1), ((2, 2), (2, 2)),
                                 dimension_numbers=dn1)
    y = jax.nn.relu(y + raw["conv1_b"][None, :, None, None])
    y = lax.reduce_window(y, 0.0, lax.add, (1, 1, 2, 2), (1, 1, 2, 2), "VALID") * 0.25
    dn2 = lax.conv_dimension_numbers(y.shape, raw["conv2_w"].shape,
                                     ("NCHW", "OIHW", "NCHW"))
    y = lax.conv_general_dilated(y, raw["conv2_w"], (1, 1), ((0, 0), (0, 0)),
                                 dimension_numbers=dn2)
    y = jax.nn.relu(y + raw["conv2_b"][None, :, None, None])
    y = lax.reduce_window(y, 0.0, lax.add, (1, 1, 2, 2), (1, 1, 2, 2), "VALID") * 0.25
    y = y.reshape(y.shape[0], -1)
    y = jax.nn.relu(y @ raw["fc1_w"].T + raw["fc1_b"])
    y = jax.nn.relu(y @ raw["fc2_w"].T + raw["fc2_b"])
    return y @ raw["fc3_w"].T + raw["fc3_b"]


if __name__ == "__main__":
    key = jax.random.PRNGKey(0)
    k_x, k_p = jax.random.split(key)
    # Input shape required by the module (fc1 expects 16*5*5 => 28x28 images).
    x = jax.random.normal(k_x, (2, 1, 28, 28), F32)
    raw = init_raw_params(k_p)
    packed = pack_params(raw)          # one-time weight repack (outside forward)

    out = jax.block_until_ready(net_forward(x, packed))
    assert out.shape == (2, 10) and out.dtype == F32

    ref = net_forward_ref(x, raw)
    err = float(jnp.max(jnp.abs(out - ref)))
    assert err < 5e-2, f"mismatch vs reference: max abs err {err}"
    print("KERNEL_OK")
</pallas_src>

<mosaic_0001>
module attributes {stable_mosaic.version = 11 : i64} {
  func.func @_lenet_kernel(%arg0: i32, %arg1: memref<1x32x32xf32, #tpu.memory_space<vmem>>, %arg2: memref<5x32x168xbf16, #tpu.memory_space<vmem>>, %arg3: memref<1x168xf32, #tpu.memory_space<vmem>>, %arg4: memref<14x28xbf16, #tpu.memory_space<vmem>>, %arg5: memref<5x168x160xbf16, #tpu.memory_space<vmem>>, %arg6: memref<1x160xf32, #tpu.memory_space<vmem>>, %arg7: memref<5x10xbf16, #tpu.memory_space<vmem>>, %arg8: memref<5x160x128xbf16, #tpu.memory_space<vmem>>, %arg9: memref<1x128xf32, #tpu.memory_space<vmem>>, %arg10: memref<128x128xbf16, #tpu.memory_space<vmem>>, %arg11: memref<1x128xf32, #tpu.memory_space<vmem>>, %arg12: memref<128x128xbf16, #tpu.memory_space<vmem>>, %arg13: memref<1x128xf32, #tpu.memory_space<vmem>>, %arg14: memref<1x1x128xf32, #tpu.memory_space<vmem>>) attributes {dimension_semantics = [#tpu.dimension_semantics<parallel>], iteration_bounds = array<i64: 2>, scalar_prefetch = 0 : i64, scratch_operands = 0 : i64, tpu.core_type = #tpu.core_type<tc>, window_params = [{transform_indices = @transform_0, window_bounds = array<i64: 1, 32, 32>}, {pipeline_mode = #tpu.pipeline_mode<synchronous>, transform_indices = @transform_1, window_bounds = array<i64: 5, 32, 168>}, {pipeline_mode = #tpu.pipeline_mode<synchronous>, transform_indices = @transform_2, window_bounds = array<i64: 1, 168>}, {pipeline_mode = #tpu.pipeline_mode<synchronous>, transform_indices = @transform_3, window_bounds = array<i64: 14, 28>}, {pipeline_mode = #tpu.pipeline_mode<synchronous>, transform_indices = @transform_4, window_bounds = array<i64: 5, 168, 160>}, {pipeline_mode = #tpu.pipeline_mode<synchronous>, transform_indices = @transform_5, window_bounds = array<i64: 1, 160>}, {pipeline_mode = #tpu.pipeline_mode<synchronous>, transform_indices = @transform_6, window_bounds = array<i64: 5, 10>}, {pipeline_mode = #tpu.pipeline_mode<synchronous>, transform_indices = @transform_7, window_bounds = array<i64: 5, 160, 128>}, {pipeline_mode = #tpu.pipeline_mode<synchronous>, transform_indices = @transform_8, window_bounds = array<i64: 1, 128>}, {pipeline_mode = #tpu.pipeline_mode<synchronous>, transform_indices = @transform_9, window_bounds = array<i64: 128, 128>}, {pipeline_mode = #tpu.pipeline_mode<synchronous>, transform_indices = @transform_10, window_bounds = array<i64: 1, 128>}, {pipeline_mode = #tpu.pipeline_mode<synchronous>, transform_indices = @transform_11, window_bounds = array<i64: 128, 128>}, {pipeline_mode = #tpu.pipeline_mode<synchronous>, transform_indices = @transform_12, window_bounds = array<i64: 1, 128>}, {transform_indices = @transform_13, window_bounds = array<i64: 1, 1, 128>}]} {
    %cst = arith.constant 0.000000e+00 : f32
    %0 = vector.broadcast %cst : f32 to vector<28x168xf32>
    %c0 = arith.constant 0 : index
    %c0_0 = arith.constant 0 : index
    %c0_1 = arith.constant 0 : index
    %1 = vector.load %arg1[%c0, %c0_0, %c0_1] : memref<1x32x32xf32, #tpu.memory_space<vmem>>, vector<1x28x32xf32>
    %2 = vector.shape_cast %1 : vector<1x28x32xf32> to vector<28x32xf32>
    %3 = arith.truncf %2 : vector<28x32xf32> to vector<28x32xbf16>
    %c0_2 = arith.constant 0 : index
    %c0_3 = arith.constant 0 : index
    %c0_4 = arith.constant 0 : index
    %4 = vector.load %arg2[%c0_2, %c0_3, %c0_4] : memref<5x32x168xbf16, #tpu.memory_space<vmem>>, vector<1x32x168xbf16>
    %5 = vector.shape_cast %4 : vector<1x32x168xbf16> to vector<32x168xbf16>
    %cst_5 = arith.constant dense<0.000000e+00> : vector<28x168xf32>
    %6 = tpu.matmul %3, %5, %cst_5 {dimension_numbers = #tpu.dot_dimension_numbers<[1], [0], [0], [1], [0, 0, 1, 1], [], []>} : vector<28x32xbf16>, vector<32x168xbf16>, vector<28x168xf32> -> vector<28x168xf32>
    %7 = arith.addf %0, %6 : vector<28x168xf32>
    %c0_6 = arith.constant 0 : index
    %c1 = arith.constant 1 : index
    %c0_7 = arith.constant 0 : index
    %8 = vector.load %arg1[%c0_6, %c1, %c0_7] : memref<1x32x32xf32, #tpu.memory_space<vmem>>, vector<1x28x32xf32>
    %9 = vector.shape_cast %8 : vector<1x28x32xf32> to vector<28x32xf32>
    %10 = arith.truncf %9 : vector<28x32xf32> to vector<28x32xbf16>
    %c1_8 = arith.constant 1 : index
    %c0_9 = arith.constant 0 : index
    %c0_10 = arith.constant 0 : index
    %11 = vector.load %arg2[%c1_8, %c0_9, %c0_10] : memref<5x32x168xbf16, #tpu.memory_space<vmem>>, vector<1x32x168xbf16>
    %12 = vector.shape_cast %11 : vector<1x32x168xbf16> to vector<32x168xbf16>
    %cst_11 = arith.constant dense<0.000000e+00> : vector<28x168xf32>
    %13 = tpu.matmul %10, %12, %cst_11 {dimension_numbers = #tpu.dot_dimension_numbers<[1], [0], [0], [1], [0, 0, 1, 1], [], []>} : vector<28x32xbf16>, vector<32x168xbf16>, vector<28x168xf32> -> vector<28x168xf32>
    %14 = arith.addf %7, %13 : vector<28x168xf32>
    %c0_12 = arith.constant 0 : index
    %c2 = arith.constant 2 : index
    %c0_13 = arith.constant 0 : index
    %15 = vector.load %arg1[%c0_12, %c2, %c0_13] : memref<1x32x32xf32, #tpu.memory_space<vmem>>, vector<1x28x32xf32>
    %16 = vector.shape_cast %15 : vector<1x28x32xf32> to vector<28x32xf32>
    %17 = arith.truncf %16 : vector<28x32xf32> to vector<28x32xbf16>
    %c2_14 = arith.constant 2 : index
    %c0_15 = arith.constant 0 : index
    %c0_16 = arith.constant 0 : index
    %18 = vector.load %arg2[%c2_14, %c0_15, %c0_16] : memref<5x32x168xbf16, #tpu.memory_space<vmem>>, vector<1x32x168xbf16>
    %19 = vector.shape_cast %18 : vector<1x32x168xbf16> to vector<32x168xbf16>
    %cst_17 = arith.constant dense<0.000000e+00> : vector<28x168xf32>
    %20 = tpu.matmul %17, %19, %cst_17 {dimension_numbers = #tpu.dot_dimension_numbers<[1], [0], [0], [1], [0, 0, 1, 1], [], []>} : vector<28x32xbf16>, vector<32x168xbf16>, vector<28x168xf32> -> vector<28x168xf32>
    %21 = arith.addf %14, %20 : vector<28x168xf32>
    %c0_18 = arith.constant 0 : index
    %c3 = arith.constant 3 : index
    %c0_19 = arith.constant 0 : index
    %22 = vector.load %arg1[%c0_18, %c3, %c0_19] : memref<1x32x32xf32, #tpu.memory_space<vmem>>, vector<1x28x32xf32>
    %23 = vector.shape_cast %22 : vector<1x28x32xf32> to vector<28x32xf32>
    %24 = arith.truncf %23 : vector<28x32xf32> to vector<28x32xbf16>
    %c3_20 = arith.constant 3 : index
    %c0_21 = arith.constant 0 : index
    %c0_22 = arith.constant 0 : index
    %25 = vector.load %arg2[%c3_20, %c0_21, %c0_22] : memref<5x32x168xbf16, #tpu.memory_space<vmem>>, vector<1x32x168xbf16>
    %26 = vector.shape_cast %25 : vector<1x32x168xbf16> to vector<32x168xbf16>
    %cst_23 = arith.constant dense<0.000000e+00> : vector<28x168xf32>
    %27 = tpu.matmul %24, %26, %cst_23 {dimension_numbers = #tpu.dot_dimension_numbers<[1], [0], [0], [1], [0, 0, 1, 1], [], []>} : vector<28x32xbf16>, vector<32x168xbf16>, vector<28x168xf32> -> vector<28x168xf32>
    %28 = arith.addf %21, %27 : vector<28x168xf32>
    %c0_24 = arith.constant 0 : index
    %c4 = arith.constant 4 : index
    %c0_25 = arith.constant 0 : index
    %29 = vector.load %arg1[%c0_24, %c4, %c0_25] : memref<1x32x32xf32, #tpu.memory_space<vmem>>, vector<1x28x32xf32>
    %30 = vector.shape_cast %29 : vector<1x28x32xf32> to vector<28x32xf32>
    %31 = arith.truncf %30 : vector<28x32xf32> to vector<28x32xbf16>
    %c4_26 = arith.constant 4 : index
    %c0_27 = arith.constant 0 : index
    %c0_28 = arith.constant 0 : index
    %32 = vector.load %arg2[%c4_26, %c0_27, %c0_28] : memref<5x32x168xbf16, #tpu.memory_space<vmem>>, vector<1x32x168xbf16>
    %33 = vector.shape_cast %32 : vector<1x32x168xbf16> to vector<32x168xbf16>
    %cst_29 = arith.constant dense<0.000000e+00> : vector<28x168xf32>
    %34 = tpu.matmul %31, %33, %cst_29 {dimension_numbers = #tpu.dot_dimension_numbers<[1], [0], [0], [1], [0, 0, 1, 1], [], []>} : vector<28x32xbf16>, vector<32x168xbf16>, vector<28x168xf32> -> vector<28x168xf32>
    %35 = arith.addf %28, %34 : vector<28x168xf32>
    %c0_30 = arith.constant 0 : index
    %c0_31 = arith.constant 0 : index
    %36 = vector.load %arg3[%c0_30, %c0_31] : memref<1x168xf32, #tpu.memory_space<vmem>>, vector<1x168xf32>
    %37 = vector.broadcast %36 : vector<1x168xf32> to vector<28x168xf32>
    %38 = arith.addf %35, %37 : vector<28x168xf32>
    %cst_32 = arith.constant 0.000000e+00 : f32
    %39 = vector.broadcast %cst_32 : f32 to vector<28x168xf32>
    %40 = arith.maximumf %38, %39 : vector<28x168xf32>
    %c0_33 = arith.constant 0 : index
    %c0_34 = arith.constant 0 : index
    %41 = vector.load %arg4[%c0_33, %c0_34] : memref<14x28xbf16, #tpu.memory_space<vmem>>, vector<14x28xbf16>
    %42 = arith.truncf %40 : vector<28x168xf32> to vector<28x168xbf16>
    %cst_35 = arith.constant dense<0.000000e+00> : vector<14x168xf32>
    %43 = tpu.matmul %41, %42, %cst_35 {dimension_numbers = #tpu.dot_dimension_numbers<[1], [0], [0], [1], [0, 0, 1, 1], [], []>} : vector<14x28xbf16>, vector<28x168xbf16>, vector<14x168xf32> -> vector<14x168xf32>
    %cst_36 = arith.constant 0.000000e+00 : f32
    %44 = vector.broadcast %cst_36 : f32 to vector<10x160xf32>
    %45 = vector.extract_strided_slice %43 {offsets = [0, 0], sizes = [10, 168], strides = [1, 1]} : vector<14x168xf32> to vector<10x168xf32>
    %46 = arith.truncf %45 : vector<10x168xf32> to vector<10x168xbf16>
    %c0_37 = arith.constant 0 : index
    %c0_38 = arith.constant 0 : index
    %c0_39 = arith.constant 0 : index
    %47 = vector.load %arg5[%c0_37, %c0_38, %c0_39] : memref<5x168x160xbf16, #tpu.memory_space<vmem>>, vector<1x168x160xbf16>
    %48 = vector.shape_cast %47 : vector<1x168x160xbf16> to vector<168x160xbf16>
    %cst_40 = arith.constant dense<0.000000e+00> : vector<10x160xf32>
    %49 = tpu.matmul %46, %48, %cst_40 {dimension_numbers = #tpu.dot_dimension_numbers<[1], [0], [0], [1], [0, 0, 1, 1], [], []>} : vector<10x168xbf16>, vector<168x160xbf16>, vector<10x160xf32> -> vector<10x160xf32>
    %50 = arith.addf %44, %49 : vector<10x160xf32>
    %51 = vector.extract_strided_slice %43 {offsets = [1, 0], sizes = [10, 168], strides = [1, 1]} : vector<14x168xf32> to vector<10x168xf32>
    %52 = arith.truncf %51 : vector<10x168xf32> to vector<10x168xbf16>
    %c1_41 = arith.constant 1 : index
    %c0_42 = arith.constant 0 : index
    %c0_43 = arith.constant 0 : index
    %53 = vector.load %arg5[%c1_41, %c0_42, %c0_43] : memref<5x168x160xbf16, #tpu.memory_space<vmem>>, vector<1x168x160xbf16>
    %54 = vector.shape_cast %53 : vector<1x168x160xbf16> to vector<168x160xbf16>
    %cst_44 = arith.constant dense<0.000000e+00> : vector<10x160xf32>
    %55 = tpu.matmul %52, %54, %cst_44 {dimension_numbers = #tpu.dot_dimension_numbers<[1], [0], [0], [1], [0, 0, 1, 1], [], []>} : vector<10x168xbf16>, vector<168x160xbf16>, vector<10x160xf32> -> vector<10x160xf32>
    %56 = arith.addf %50, %55 : vector<10x160xf32>
    %57 = vector.extract_strided_slice %43 {offsets = [2, 0], sizes = [10, 168], strides = [1, 1]} : vector<14x168xf32> to vector<10x168xf32>
    %58 = arith.truncf %57 : vector<10x168xf32> to vector<10x168xbf16>
    %c2_45 = arith.constant 2 : index
    %c0_46 = arith.constant 0 : index
    %c0_47 = arith.constant 0 : index
    %59 = vector.load %arg5[%c2_45, %c0_46, %c0_47] : memref<5x168x160xbf16, #tpu.memory_space<vmem>>, vector<1x168x160xbf16>
    %60 = vector.shape_cast %59 : vector<1x168x160xbf16> to vector<168x160xbf16>
    %cst_48 = arith.constant dense<0.000000e+00> : vector<10x160xf32>
    %61 = tpu.matmul %58, %60, %cst_48 {dimension_numbers = #tpu.dot_dimension_numbers<[1], [0], [0], [1], [0, 0, 1, 1], [], []>} : vector<10x168xbf16>, vector<168x160xbf16>, vector<10x160xf32> -> vector<10x160xf32>
    %62 = arith.addf %56, %61 : vector<10x160xf32>
    %63 = vector.extract_strided_slice %43 {offsets = [3, 0], sizes = [10, 168], strides = [1, 1]} : vector<14x168xf32> to vector<10x168xf32>
    %64 = arith.truncf %63 : vector<10x168xf32> to vector<10x168xbf16>
    %c3_49 = arith.constant 3 : index
    %c0_50 = arith.constant 0 : index
    %c0_51 = arith.constant 0 : index
    %65 = vector.load %arg5[%c3_49, %c0_50, %c0_51] : memref<5x168x160xbf16, #tpu.memory_space<vmem>>, vector<1x168x160xbf16>
    %66 = vector.shape_cast %65 : vector<1x168x160xbf16> to vector<168x160xbf16>
    %cst_52 = arith.constant dense<0.000000e+00> : vector<10x160xf32>
    %67 = tpu.matmul %64, %66, %cst_52 {dimension_numbers = #tpu.dot_dimension_numbers<[1], [0], [0], [1], [0, 0, 1, 1], [], []>} : vector<10x168xbf16>, vector<168x160xbf16>, vector<10x160xf32> -> vector<10x160xf32>
    %68 = arith.addf %62, %67 : vector<10x160xf32>
    %69 = vector.extract_strided_slice %43 {offsets = [4, 0], sizes = [10, 168], strides = [1, 1]} : vector<14x168xf32> to vector<10x168xf32>
    %70 = arith.truncf %69 : vector<10x168xf32> to vector<10x168xbf16>
    %c4_53 = arith.constant 4 : index
    %c0_54 = arith.constant 0 : index
    %c0_55 = arith.constant 0 : index
    %71 = vector.load %arg5[%c4_53, %c0_54, %c0_55] : memref<5x168x160xbf16, #tpu.memory_space<vmem>>, vector<1x168x160xbf16>
    %72 = vector.shape_cast %71 : vector<1x168x160xbf16> to vector<168x160xbf16>
    %cst_56 = arith.constant dense<0.000000e+00> : vector<10x160xf32>
    %73 = tpu.matmul %70, %72, %cst_56 {dimension_numbers = #tpu.dot_dimension_numbers<[1], [0], [0], [1], [0, 0, 1, 1], [], []>} : vector<10x168xbf16>, vector<168x160xbf16>, vector<10x160xf32> -> vector<10x160xf32>
    %74 = arith.addf %68, %73 : vector<10x160xf32>
    %c0_57 = arith.constant 0 : index
    %c0_58 = arith.constant 0 : index
    %75 = vector.load %arg6[%c0_57, %c0_58] : memref<1x160xf32, #tpu.memory_space<vmem>>, vector<1x160xf32>
    %76 = vector.broadcast %75 : vector<1x160xf32> to vector<10x160xf32>
    %77 = arith.addf %74, %76 : vector<10x160xf32>
    %cst_59 = arith.constant 0.000000e+00 : f32
    %78 = vector.broadcast %cst_59 : f32 to vector<10x160xf32>
    %79 = arith.maximumf %77, %78 : vector<10x160xf32>
    %c0_60 = arith.constant 0 : index
    %c0_61 = arith.constant 0 : index
    %80 = vector.load %arg7[%c0_60, %c0_61] : memref<5x10xbf16, #tpu.memory_space<vmem>>, vector<5x10xbf16>
    %81 = arith.truncf %79 : vector<10x160xf32> to vector<10x160xbf16>
    %cst_62 = arith.constant dense<0.000000e+00> : vector<5x160xf32>
    %82 = tpu.matmul %80, %81, %cst_62 {dimension_numbers = #tpu.dot_dimension_numbers<[1], [0], [0], [1], [0, 0, 1, 1], [], []>} : vector<5x10xbf16>, vector<10x160xbf16>, vector<5x160xf32> -> vector<5x160xf32>
    %cst_63 = arith.constant 0.000000e+00 : f32
    %83 = vector.broadcast %cst_63 : f32 to vector<1x128xf32>
    %84 = vector.extract_strided_slice %82 {offsets = [0, 0], sizes = [1, 160], strides = [1, 1]} : vector<5x160xf32> to vector<1x160xf32>
    %85 = arith.truncf %84 : vector<1x160xf32> to vector<1x160xbf16>
    %c0_64 = arith.constant 0 : index
    %c0_65 = arith.constant 0 : index
    %c0_66 = arith.constant 0 : index
    %86 = vector.load %arg8[%c0_64, %c0_65, %c0_66] : memref<5x160x128xbf16, #tpu.memory_space<vmem>>, vector<1x160x128xbf16>
    %87 = vector.shape_cast %86 : vector<1x160x128xbf16> to vector<160x128xbf16>
    %cst_67 = arith.constant dense<0.000000e+00> : vector<1x128xf32>
    %88 = tpu.matmul %85, %87, %cst_67 {dimension_numbers = #tpu.dot_dimension_numbers<[1], [0], [0], [1], [0, 0, 1, 1], [], []>} : vector<1x160xbf16>, vector<160x128xbf16>, vector<1x128xf32> -> vector<1x128xf32>
    %89 = arith.addf %83, %88 : vector<1x128xf32>
    %90 = vector.extract_strided_slice %82 {offsets = [1, 0], sizes = [1, 160], strides = [1, 1]} : vector<5x160xf32> to vector<1x160xf32>
    %91 = arith.truncf %90 : vector<1x160xf32> to vector<1x160xbf16>
    %c1_68 = arith.constant 1 : index
    %c0_69 = arith.constant 0 : index
    %c0_70 = arith.constant 0 : index
    %92 = vector.load %arg8[%c1_68, %c0_69, %c0_70] : memref<5x160x128xbf16, #tpu.memory_space<vmem>>, vector<1x160x128xbf16>
    %93 = vector.shape_cast %92 : vector<1x160x128xbf16> to vector<160x128xbf16>
    %cst_71 = arith.constant dense<0.000000e+00> : vector<1x128xf32>
    %94 = tpu.matmul %91, %93, %cst_71 {dimension_numbers = #tpu.dot_dimension_numbers<[1], [0], [0], [1], [0, 0, 1, 1], [], []>} : vector<1x160xbf16>, vector<160x128xbf16>, vector<1x128xf32> -> vector<1x128xf32>
    %95 = arith.addf %89, %94 : vector<1x128xf32>
    %96 = vector.extract_strided_slice %82 {offsets = [2, 0], sizes = [1, 160], strides = [1, 1]} : vector<5x160xf32> to vector<1x160xf32>
    %97 = arith.truncf %96 : vector<1x160xf32> to vector<1x160xbf16>
    %c2_72 = arith.constant 2 : index
    %c0_73 = arith.constant 0 : index
    %c0_74 = arith.constant 0 : index
    %98 = vector.load %arg8[%c2_72, %c0_73, %c0_74] : memref<5x160x128xbf16, #tpu.memory_space<vmem>>, vector<1x160x128xbf16>
    %99 = vector.shape_cast %98 : vector<1x160x128xbf16> to vector<160x128xbf16>
    %cst_75 = arith.constant dense<0.000000e+00> : vector<1x128xf32>
    %100 = tpu.matmul %97, %99, %cst_75 {dimension_numbers = #tpu.dot_dimension_numbers<[1], [0], [0], [1], [0, 0, 1, 1], [], []>} : vector<1x160xbf16>, vector<160x128xbf16>, vector<1x128xf32> -> vector<1x128xf32>
    %101 = arith.addf %95, %100 : vector<1x128xf32>
    %102 = vector.extract_strided_slice %82 {offsets = [3, 0], sizes = [1, 160], strides = [1, 1]} : vector<5x160xf32> to vector<1x160xf32>
    %103 = arith.truncf %102 : vector<1x160xf32> to vector<1x160xbf16>
    %c3_76 = arith.constant 3 : index
    %c0_77 = arith.constant 0 : index
    %c0_78 = arith.constant 0 : index
    %104 = vector.load %arg8[%c3_76, %c0_77, %c0_78] : memref<5x160x128xbf16, #tpu.memory_space<vmem>>, vector<1x160x128xbf16>
    %105 = vector.shape_cast %104 : vector<1x160x128xbf16> to vector<160x128xbf16>
    %cst_79 = arith.constant dense<0.000000e+00> : vector<1x128xf32>
    %106 = tpu.matmul %103, %105, %cst_79 {dimension_numbers = #tpu.dot_dimension_numbers<[1], [0], [0], [1], [0, 0, 1, 1], [], []>} : vector<1x160xbf16>, vector<160x128xbf16>, vector<1x128xf32> -> vector<1x128xf32>
    %107 = arith.addf %101, %106 : vector<1x128xf32>
    %108 = vector.extract_strided_slice %82 {offsets = [4, 0], sizes = [1, 160], strides = [1, 1]} : vector<5x160xf32> to vector<1x160xf32>
    %109 = arith.truncf %108 : vector<1x160xf32> to vector<1x160xbf16>
    %c4_80 = arith.constant 4 : index
    %c0_81 = arith.constant 0 : index
    %c0_82 = arith.constant 0 : index
    %110 = vector.load %arg8[%c4_80, %c0_81, %c0_82] : memref<5x160x128xbf16, #tpu.memory_space<vmem>>, vector<1x160x128xbf16>
    %111 = vector.shape_cast %110 : vector<1x160x128xbf16> to vector<160x128xbf16>
    %cst_83 = arith.constant dense<0.000000e+00> : vector<1x128xf32>
    %112 = tpu.matmul %109, %111, %cst_83 {dimension_numbers = #tpu.dot_dimension_numbers<[1], [0], [0], [1], [0, 0, 1, 1], [], []>} : vector<1x160xbf16>, vector<160x128xbf16>, vector<1x128xf32> -> vector<1x128xf32>
    %113 = arith.addf %107, %112 : vector<1x128xf32>
    %c0_84 = arith.constant 0 : index
    %c0_85 = arith.constant 0 : index
    %114 = vector.load %arg9[%c0_84, %c0_85] : memref<1x128xf32, #tpu.memory_space<vmem>>, vector<1x128xf32>
    %115 = arith.addf %113, %114 : vector<1x128xf32>
    %cst_86 = arith.constant 0.000000e+00 : f32
    %116 = vector.broadcast %cst_86 : f32 to vector<1x128xf32>
    %117 = arith.maximumf %115, %116 : vector<1x128xf32>
    %118 = arith.truncf %117 : vector<1x128xf32> to vector<1x128xbf16>
    %c0_87 = arith.constant 0 : index
    %c0_88 = arith.constant 0 : index
    %119 = vector.load %arg10[%c0_87, %c0_88] : memref<128x128xbf16, #tpu.memory_space<vmem>>, vector<128x128xbf16>
    %cst_89 = arith.constant dense<0.000000e+00> : vector<1x128xf32>
    %120 = tpu.matmul %118, %119, %cst_89 {dimension_numbers = #tpu.dot_dimension_numbers<[1], [0], [0], [1], [0, 0, 1, 1], [], []>} : vector<1x128xbf16>, vector<128x128xbf16>, vector<1x128xf32> -> vector<1x128xf32>
    %c0_90 = arith.constant 0 : index
    %c0_91 = arith.constant 0 : index
    %121 = vector.load %arg11[%c0_90, %c0_91] : memref<1x128xf32, #tpu.memory_space<vmem>>, vector<1x128xf32>
    %122 = arith.addf %120, %121 : vector<1x128xf32>
    %cst_92 = arith.constant 0.000000e+00 : f32
    %123 = vector.broadcast %cst_92 : f32 to vector<1x128xf32>
    %124 = arith.maximumf %122, %123 : vector<1x128xf32>
    %125 = arith.truncf %124 : vector<1x128xf32> to vector<1x128xbf16>
    %c0_93 = arith.constant 0 : index
    %c0_94 = arith.constant 0 : index
    %126 = vector.load %arg12[%c0_93, %c0_94] : memref<128x128xbf16, #tpu.memory_space<vmem>>, vector<128x128xbf16>
    %cst_95 = arith.constant dense<0.000000e+00> : vector<1x128xf32>
    %127 = tpu.matmul %125, %126, %cst_95 {dimension_numbers = #tpu.dot_dimension_numbers<[1], [0], [0], [1], [0, 0, 1, 1], [], []>} : vector<1x128xbf16>, vector<128x128xbf16>, vector<1x128xf32> -> vector<1x128xf32>
    %c0_96 = arith.constant 0 : index
    %c0_97 = arith.constant 0 : index
    %128 = vector.load %arg13[%c0_96, %c0_97] : memref<1x128xf32, #tpu.memory_space<vmem>>, vector<1x128xf32>
    %129 = arith.addf %127, %128 : vector<1x128xf32>
    %c0_98 = arith.constant 0 : index
    %c0_99 = arith.constant 0 : index
    %c0_100 = arith.constant 0 : index
    %130 = vector.load %arg14[%c0_98, %c0_99, %c0_100] : memref<1x1x128xf32, #tpu.memory_space<vmem>>, vector<1x1x128xf32>
    %131 = vector.shape_cast %130 : vector<1x1x128xf32> to vector<1x128xf32>
    %132 = vector.shape_cast %129 : vector<1x128xf32> to vector<1x1x128xf32>
    tpu.vector_store %arg14[%c0_98, %c0_99, %c0_100], %132 {strides = array<i32>} : memref<1x1x128xf32, #tpu.memory_space<vmem>>, vector<1x1x128xf32>,
    return
  }
  func.func @transform_0(%arg0: i32) -> (i32, i32, i32) {
    %c0_i32 = arith.constant 0 : i32
    %c0_i32_0 = arith.constant 0 : i32
    %c0_i32_1 = arith.constant 0 : i32
    return %arg0, %c0_i32, %c0_i32_0 : i32, i32, i32
  }
  func.func @transform_1(%arg0: i32) -> (i32, i32, i32) {
    %c0_i32 = arith.constant 0 : i32
    %c0_i32_0 = arith.constant 0 : i32
    %c0_i32_1 = arith.constant 0 : i32
    %c0_i32_2 = arith.constant 0 : i32
    return %c0_i32, %c0_i32_0, %c0_i32_1 : i32, i32, i32
  }
  func.func @transform_2(%arg0: i32) -> (i32, i32) {
    %c0_i32 = arith.constant 0 : i32
    %c0_i32_0 = arith.constant 0 : i32
    %c0_i32_1 = arith.constant 0 : i32
    return %c0_i32, %c0_i32_0 : i32, i32
  }
  func.func @transform_3(%arg0: i32) -> (i32, i32) {
    %c0_i32 = arith.constant 0 : i32
    %c0_i32_0 = arith.constant 0 : i32
    %c0_i32_1 = arith.constant 0 : i32
    return %c0_i32, %c0_i32_0 : i32, i32
  }
  func.func @transform_4(%arg0: i32) -> (i32, i32, i32) {
    %c0_i32 = arith.constant 0 : i32
    %c0_i32_0 = arith.constant 0 : i32
    %c0_i32_1 = arith.constant 0 : i32
    %c0_i32_2 = arith.constant 0 : i32
    return %c0_i32, %c0_i32_0, %c0_i32_1 : i32, i32, i32
  }
  func.func @transform_5(%arg0: i32) -> (i32, i32) {
    %c0_i32 = arith.constant 0 : i32
    %c0_i32_0 = arith.constant 0 : i32
    %c0_i32_1 = arith.constant 0 : i32
    return %c0_i32, %c0_i32_0 : i32, i32
  }
  func.func @transform_6(%arg0: i32) -> (i32, i32) {
    %c0_i32 = arith.constant 0 : i32
    %c0_i32_0 = arith.constant 0 : i32
    %c0_i32_1 = arith.constant 0 : i32
    return %c0_i32, %c0_i32_0 : i32, i32
  }
  func.func @transform_7(%arg0: i32) -> (i32, i32, i32) {
    %c0_i32 = arith.constant 0 : i32
    %c0_i32_0 = arith.constant 0 : i32
    %c0_i32_1 = arith.constant 0 : i32
    %c0_i32_2 = arith.constant 0 : i32
    return %c0_i32, %c0_i32_0, %c0_i32_1 : i32, i32, i32
  }
  func.func @transform_8(%arg0: i32) -> (i32, i32) {
    %c0_i32 = arith.constant 0 : i32
    %c0_i32_0 = arith.constant 0 : i32
    %c0_i32_1 = arith.constant 0 : i32
    return %c0_i32, %c0_i32_0 : i32, i32
  }
  func.func @transform_9(%arg0: i32) -> (i32, i32) {
    %c0_i32 = arith.constant 0 : i32
    %c0_i32_0 = arith.constant 0 : i32
    %c0_i32_1 = arith.constant 0 : i32
    return %c0_i32, %c0_i32_0 : i32, i32
  }
  func.func @transform_10(%arg0: i32) -> (i32, i32) {
    %c0_i32 = arith.constant 0 : i32
    %c0_i32_0 = arith.constant 0 : i32
    %c0_i32_1 = arith.constant 0 : i32
    return %c0_i32, %c0_i32_0 : i32, i32
  }
  func.func @transform_11(%arg0: i32) -> (i32, i32) {
    %c0_i32 = arith.constant 0 : i32
    %c0_i32_0 = arith.constant 0 : i32
    %c0_i32_1 = arith.constant 0 : i32
    return %c0_i32, %c0_i32_0 : i32, i32
  }
  func.func @transform_12(%arg0: i32) -> (i32, i32) {
    %c0_i32 = arith.constant 0 : i32
    %c0_i32_0 = arith.constant 0 : i32
    %c0_i32_1 = arith.constant 0 : i32
    return %c0_i32, %c0_i32_0 : i32, i32
  }
  func.func @transform_13(%arg0: i32) -> (i32, i32, i32) {
    %c0_i32 = arith.constant 0 : i32
    %c0_i32_0 = arith.constant 0 : i32
    %c0_i32_1 = arith.constant 0 : i32
    return %arg0, %c0_i32, %c0_i32_0 : i32, i32, i32
  }
}

</mosaic_0001>

<bundles_post_ra>
// kernel: net_forward.1
= control target key start
LH: loop header
LB: loop body
LE: loop exit
PB: predicated region body
PF: predicated region fallthrough
CT: control target
= control target key end

     0   :  { %18 = vsyncpa [#allocation3], 0  ;;  %s4795_s0 = inlined_call_operand.vmem [shape: f32[2,32,32], index: 0, kind: input, shape index: {}]   ;;  %s4796_s1 = inlined_call_operand.vmem [shape: bf16[5,32,168], index: 1, kind: input, shape index: {}]   ;;  %s4797_s2 = inlined_call_operand.vmem [shape: f32[1,168], index: 2, kind: input, shape index: {}]   ;;  %s4798_s3 = inlined_call_operand.vmem [shape: bf16[14,28], index: 3, kind: input, shape index: {}]   ;;  %s4799_s4 = inlined_call_operand.vmem [shape: bf16[5,168,160], index: 4, kind: input, shape index: {}]   ;;  %s4800_s5 = inlined_call_operand.vmem [shape: f32[1,160], index: 5, kind: input, shape index: {}]   ;;  %s4801_s6 = inlined_call_operand.vmem [shape: bf16[5,10], index: 6, kind: input, shape index: {}]   ;;  %s4802_s7 = inlined_call_operand.vmem [shape: bf16[5,160,128], index: 7, kind: input, shape index: {}]   ;;  %s4803_s8 = inlined_call_operand.vmem [shape: f32[1,128], index: 8, kind: input, shape index: {}]   ;;  %s4804_s9 = inlined_call_operand.vmem [shape: bf16[128,128], index: 9, kind: input, shape index: {}]   ;;  %s4805_s10 = inlined_call_operand.vmem [shape: f32[1,128], index: 10, kind: input, shape index: {}]   ;;  %s4806_s11 = inlined_call_operand.vmem [shape: bf16[128,128], index: 11, kind: input, shape index: {}]   ;;  %s4807_s12 = inlined_call_operand.vmem [shape: f32[1,128], index: 12, kind: input, shape index: {}]   ;;  %s4808_s13 = inlined_call_operand.hbm [shape: f32[2,1,128], index: 13, kind: output, shape index: {}]  }
   0x1   :  { %20 = vsyncpa [#allocation3 + $0x1], 0  ;;  %s3905_s25 = smov 0   ;;  %s3907_s26 = smov 0  }
   0x2   :  { %s3909_s27 = smov 0   ;;  %s3911_s28 = smov 0  }
   0x3 LB: > { %4812 = sst [smem:[#allocation5_spill]] %s3825_s27  ;;  %s3926_s29 = sadd.s32 4294967295, %s3829_s28   ;;  %s3829_s28 = sphi %s3911_s28, %s4817_s28   ;;  %s3825_s27 = sphi %s3909_s27, %s4819_s27   ;;  %s3821_s26 = sphi %s3907_s26, %s4821_s26   ;;  %s3817_s25 = sphi %s3905_s25, %s4820_s25  }
   0x4   : > { %s2946_s30 = sadd.s32 4294967294, %s3829_s28   ;;  %s3930_s14 = sadd.s32 1, %s3829_s28  }
   0x5   : > { %4813 = sst [smem:[#allocation6_spill]] %s3930_s14  ;;  %s311_s15 = sadd.s32 1, %s3825_s27 }
   0x6   : > { %s308_s16 = ssub.s32 %s3829_s28, %s3930_s14  ;;  %p321_p0 = scmp.ne.s32.totalorder %s3825_s27, %s3821_s26 }
   0x7   : > { %p309_p1 = scmp.eq.s32.totalorder %s308_s16, 0  ;;  %p322_p2 = scmp.eq.s32.totalorder %s3926_s29, 1 }
   0x8   : > { %p327_p3 = scmp.ne.s32.totalorder %s3821_s26, %s3817_s25  ;;  %p328_p4 = scmp.eq.s32.totalorder %s2946_s30, 1 }
   0x9   : > { %s3941_s17 = scalar_select %p309_p1, %s3825_s27, %s311_s15  }
   0xa   : > { %p3943_p5 = por %p322_p2, %p321_p0  ;;  %p3947_p6 = por %p328_p4, %p327_p3 }
   0xb   : > { %4814 = sst [smem:[#allocation7_spill]] %s3941_s17  ;;  %p2949_p7 = scmp.ge.s32.totalorder %s3829_s28, 1 }
   0xc   : > { %p390_p8 = scmp.lt.s32.totalorder %s3829_s28, 3 }
   0xe   : > { %p391_p9 = pnand %p2949_p7, %p390_p8 }
   0xf   : > { %v3510_v0 = vld [vmem:[%s4796_s1 + $0x24] ss:$8 sps:$4 sm:$0xff] (!%p391_p9)   ;;  %p433_p10 = scmp.lt.s32.totalorder (!%p391_p9), %s3926_s29, 1  ;;  %v3512_v1 = vld [vmem:[%s4796_s1 + $0x20] ss:$8 sps:$4 sm:$0xff] (!%p391_p9)   ;;  %v3831_v2 = vmov (!%p391_p9), 0  }
  0x10   : > { %394 = sbr.rel (%p391_p9) target bundleno = 1958 (0x7a6), region = 72  ;;  %519 = vmatprep.mubr.bf16.mxu0 (!%p391_p9), %v3831_v2  ;;  %487 = vmatprep.subr.bf16.mxu0 (!%p391_p9), %v3510_v0  ;;  %v3513_v3 = vld [vmem:[%s4796_s1 + $0x34] ss:$8 sps:$4 sm:$0xff] (!%p391_p9)   ;;  %v3515_v4 = vld [vmem:[%s4796_s1 + $0x30] ss:$8 sps:$4 sm:$0xff] (!%p391_p9)   ;;  %vm480_vm0 = vcmask (!%p391_p9), 261120  }
  0x11   : > { %488 = vmatpush1.bf16.msra.mxu0 (!%p391_p9), %v3512_v1  ;;  %v3518_v5 = vld [vmem:[%s4796_s1 + $0x4] ss:$8 sps:$4 sm:$0xff] (!%p391_p9)   ;;  %v3516_v9 = vld [vmem:[%s4796_s1] ss:$8 sps:$4 sm:$0xff] (!%p391_p9)   ;;  %v3521_v10 = vld [vmem:[%s4796_s1 + $0x14] ss:$8 sps:$4 sm:$0xff] (!%p391_p9)  }
  0x12   : > { %489 = vmatprep.subr.bf16.mxu0 (!%p391_p9), %v3513_v3  ;;  %v3519_v12 = vld [vmem:[%s4796_s1 + $0x10] ss:$8 sps:$4 sm:$0xff] (!%p391_p9)   ;;  %v3524_v14 = vld [vmem:[%s4796_s1 + $0x44] ss:$8 sps:$4 sm:$0xff] (!%p391_p9)   ;;  %v3522_v18 = vld [vmem:[%s4796_s1 + $0x40] ss:$8 sps:$4 sm:$0xff] (!%p391_p9)  }
  0x13   : > { %v3527_v20 = vld [vmem:[%s4796_s1 + $0x54] ss:$8 sps:$4 sm:$0xff] (!%p391_p9)   ;;  %v3525_v23 = vld [vmem:[%s4796_s1 + $0x50] ss:$8 sps:$4 sm:$0xff] (!%p391_p9)   ;;  %v3530_v24 = vld [vmem:[%s4796_s1 + $0x64] ss:$8 sps:$4 sm:$0xff] (!%p391_p9)  }
  0x14   : > { %v3528_v28 = vld [vmem:[%s4796_s1 + $0x60] ss:$8 sps:$4 sm:$0xff] (!%p391_p9)   ;;  %v3533_v30 = vld [vmem:[%s4796_s1 + $0x74] ss:$8 sps:$4 sm:$0xff] (!%p391_p9)   ;;  %v3531_v33 = vld [vmem:[%s4796_s1 + $0x70] ss:$8 sps:$4 sm:$0xff] (!%p391_p9)  }
  0x15   : > { %490 = vmatpush1.bf16.msra.mxu0 (!%p391_p9), %v3515_v4  ;;  %v3536_v34 = vld [vmem:[%s4796_s1 + $0x84] ss:$8 sps:$4 sm:$0xff] (!%p391_p9)   ;;  %v3534_v38 = vld [vmem:[%s4796_s1 + $0x80] ss:$8 sps:$4 sm:$0xff] (!%p391_p9)   ;;  %v3539_v40 = vld [vmem:[%s4796_s1 + $0x94] ss:$8 sps:$4 sm:$0xff] (!%p391_p9)   ;;  %v915_v4 = vlaneseq (!%p391_p9) }
  0x16   : > { %566 = vmatprep.subr.bf16.mxu0 (!%p391_p9), %v3518_v5  ;;  %v3537_v43 = vld [vmem:[%s4796_s1 + $0x90] ss:$8 sps:$4 sm:$0xff] (!%p391_p9)   ;;  %v3541_v51 = vld [vmem:[%s4799_s4 + $0xac] ss:$8 sps:$4 sm:$0xff] (!%p391_p9)   ;;  %v3544_v53 = vld [vmem:[%s4799_s4 + $0xbc] ss:$8 sps:$4 sm:$0xff] (!%p391_p9)  }
  0x17   : > { %s434_s15 = scalar_select %p433_p10, %s3926_s29, 1  ;;  %v3543_v52 = vld [vmem:[%s4799_s4 + $0xa8] ss:$8 sps:$4 sm:$0xff]   ;;  %1182 = vmatprep.subr.bf16.mxu1 %v3541_v51  ;;  %v3546_v54 = vld [vmem:[%s4799_s4 + $0xb8] ss:$8 sps:$4 sm:$0xff]   ;;  %v4109_v5 = vshrl.u32 %v915_v4, 7 }
  0x18   : > { %1183 = vmatpush1.bf16.msra.mxu1 %v3543_v52  ;;  %v3547_v55 = vld [vmem:[%s4799_s4 + $0xcc] ss:$8 sps:$4 sm:$0xff]   ;;  %v3549_v56 = vld [vmem:[%s4799_s4 + $0xc8] ss:$8 sps:$4 sm:$0xff]   ;;  %v3550_v57 = vld [vmem:[%s4799_s4 + $0xdc] ss:$8 sps:$4 sm:$0xff]  }
  0x19   : > { %s3361_s21 = sshll.u32 %s434_s15, 5  ;;  %1184 = vmatprep.subr.bf16.mxu1 %v3544_v53  ;;  %v3552_v58 = vld [vmem:[%s4799_s4 + $0xd8] ss:$8 sps:$4 sm:$0xff]   ;;  %v3553_v59 = vld [vmem:[%s4799_s4 + $0xec] ss:$8 sps:$4 sm:$0xff]   ;;  %vm956_vm1 = vcmask 1045504  }
  0x1a   : > { %s3974_s14 = scalar_lea.vmem %s4795_s0, %s3361_s21  ;;  %v3555_v60 = vld [vmem:[%s4799_s4 + $0xe8] ss:$8 sps:$4 sm:$0xff]   ;;  %v3556_v61 = vld [vmem:[%s4799_s4 + $0xfc] ss:$8 sps:$4 sm:$0xff]   ;;  %v3558_v62 = vld [vmem:[%s4799_s4 + $0xf8] ss:$8 sps:$4 sm:$0xff]  }
  0x1b   : > { %v449_v6 = vld [vmem:[%s3974_s14 + $0x1] sm:$0xff]  ;;  %v450_v7 = vld [vmem:[%s3974_s14 + $0x9] sm:$0xff]  ;;  %v451_v11 = vld [vmem:[%s3974_s14 + $0x11] sm:$0xff]  ;;  %vm952_vm2 = vcmask 228352   ;;  %vm1175_vm3 = vcmask 1043456   ;;  %vm1171_vm4 = vcmask 326656  }
  0x1c   : > { %v453_v8 = vpack.c.bf16 %v450_v7, %v449_v6  ;;  %v452_v13 = vld [vmem:[%s3974_s14 + $0x19] sm:$0xf]  ;;  %v439_v16 = vld [vmem:[%s3974_s14] sm:$0xff]  ;;  %v440_v17 = vld [vmem:[%s3974_s14 + $0x8] sm:$0xff]  ;;  %1185 = vmatpush1.bf16.msra.mxu1 %v3546_v54  ;;  %v917_v6 = vsub.s32 0, %v4109_v5  ;;  %vm1972_vm5 = vcmask 1044480  }
  0x1d   : > { %v454_v15 = vpack.c.bf16 %v452_v13, %v451_v11  ;;  %v443_v19 = vpack.c.bf16 %v440_v17, %v439_v16  ;;  %v441_v21 = vld [vmem:[%s3974_s14 + $0x10] sm:$0xff]  ;;  %v442_v22 = vld [vmem:[%s3974_s14 + $0x18] sm:$0xf]  ;;  %v619_v26 = vld [vmem:[%s3974_s14 + $0x2] sm:$0xff]  ;;  %1186 = vmatprep.subr.bf16.mxu1 %v3547_v55  ;;  %vm1968_vm6 = vcmask 80896   ;;  %vm3833_vm7 = vmmov 0  }
  0x1e   : > { %2960 = vmatmul.mubr.msk.bf16.vlgmr.msra.gmra.mrb[0].mxu0 %vm480_vm0, %v453_v8  ;;  %v444_v25 = vpack.c.bf16 %v442_v22, %v441_v21  ;;  %v620_v27 = vld [vmem:[%s3974_s14 + $0xa] sm:$0xff]  ;;  %v621_v31 = vld [vmem:[%s3974_s14 + $0x12] sm:$0xff]  ;;  %v622_v32 = vld [vmem:[%s3974_s14 + $0x1a] sm:$0xf]  ;;  %v921_v8 = vsub.s32 1, %v4109_v5  ;;  %s431_s27 = sand.u32 1, %s3821_s26  }
  0x1f   : > { %567 = vmatpush1.bf16.msra.mxu0 %v3516_v9  ;;  %529 = vmatprep.mubr.bf16.mxu0 %v3831_v2  ;;  %v623_v29 = vpack.c.bf16 %v620_v27, %v619_v26  ;;  %v624_v35 = vpack.c.bf16 %v622_v32, %v621_v31  ;;  %v717_v36 = vld [vmem:[%s3974_s14 + $0x3] sm:$0xff]  ;;  %v718_v37 = vld [vmem:[%s3974_s14 + $0xb] sm:$0xff]  ;;  %v719_v41 = vld [vmem:[%s3974_s14 + $0x13] sm:$0xff]  ;;  %s3358_s16 = sshll.u32 %s3926_s29, 4  ;;  %s2879_s24 = scalar_lea.sflag [#allocation3], %s431_s27 }
  0x20   : > { %568 = vmatprep.subr.bf16.mxu0 %v3521_v10  ;;  %v721_v39 = vpack.c.bf16 %v718_v37, %v717_v36  ;;  %v720_v42 = vld [vmem:[%s3974_s14 + $0x1b] sm:$0xf]  ;;  %v815_v45 = vld [vmem:[%s3974_s14 + $0x4] sm:$0xff]  ;;  %v816_v46 = vld [vmem:[%s3974_s14 + $0xc] sm:$0xff]  ;;  %1187 = vmatpush1.bf16.msra.mxu1 %v3549_v56  ;;  %s4753_s23 = scalar_lea.hbm %s4808_s13, %s3358_s16  ;;  %s3834_s30 = smov [#allocation2]  }
  0x21   : > { %v722_v44 = vpack.c.bf16 %v720_v42, %v719_v41  ;;  %v819_v47 = vpack.c.bf16 %v816_v46, %v815_v45  ;;  %v817_v48 = vld [vmem:[%s3974_s14 + $0x14] sm:$0xff]  ;;  %v818_v49 = vld [vmem:[%s3974_s14 + $0x1c] sm:$0xf]  ;;  %1188 = vmatprep.subr.bf16.mxu1 %v3550_v57  ;;  %v3561_v0 = vld [vmem:[%s4799_s4 + $0x108] ss:$8 sps:$4 sm:$0xff]   ;;  %s432_s14 = scalar_lea.vmem [#allocation2], %s431_s27 }
  0x22   : > { %v820_v50 = vpack.c.bf16 %v818_v49, %v817_v48  ;;  %v3559_v63 = vld [vmem:[%s4799_s4 + $0x10c] ss:$8 sps:$4 sm:$0xff]   ;;  %v3562_v1 = vld [vmem:[%s4799_s4 + $0x11c] ss:$8 sps:$4 sm:$0xff]   ;;  %v3564_v3 = vld [vmem:[%s4799_s4 + $0x118] ss:$8 sps:$4 sm:$0xff]  }
  0x23   : > { %569 = vmatpush1.bf16.msra.mxu0 %v3519_v12  ;;  %v913_v7 = vld [vmem:[%s4797_s2] sm:$0x3]  ;;  %v3565_v41 = vld [vmem:[%s4799_s4 + $0x12c] ss:$8 sps:$4 sm:$0xff]   ;;  %v3567_v42 = vld [vmem:[%s4799_s4 + $0x128] ss:$8 sps:$4 sm:$0xff]  }
  0x24   : > { %656 = vmatprep.subr.bf16.mxu0 %v3524_v14  ;;  %1189 = vmatpush1.bf16.msra.mxu1 %v3552_v58  ;;  %v918_v9 = vrot.slane %v913_v7, %v917_v6  ;;  %v922_v10 = vrot.slane %v913_v7, %v921_v8  ;;  %v3021_v45 = vld [vmem:[%s4799_s4 + $0x148] sm:$0xff]  ;;  %v1965_v5 = vld [vmem:[%s4801_s6] sm:$0x7]  ;;  %s2891_s20 = sshll.u32 %s432_s14, 4  ;;  %s3771_s17 = sshll.u32 %s3834_s30, 4  ;;  %s4755_s20 = int_to_ptr.vmem [resolvable:$true] %s2891_s20  ;;  %s3772_s17 = int_to_ptr.vmem [resolvable:$false] %s3771_s17 }
  0x25   : > { %1190 = vmatprep.subr.bf16.mxu1 %v3553_v59  ;;  %v3043_v46 = vcombine.high %v3021_v45, %v3021_v45  ;;  %v3575_v49 = vld [vmem:[%s4799_s4 + $0x4] ss:$8 sps:$4 sm:$0xff]   ;;  %v3573_v7 = vld [vmem:[%s4799_s4] ss:$8 sps:$4 sm:$0xff]   ;;  %s3767_s29 = scalar_lea.vmem %s4755_s20, 16  ;;  %s3773_s15 = scalar_lea.vmem %s3772_s17, 32 }
  0x26   : > { %2961 = vmatmul.mubr.msk.bf16.gmra.mrb[4].mxu0 %vm480_vm0, %v454_v15  ;;  %p3768_p11 = scmp.ne.s32.totalorder %s4755_s20, %s3767_s29  ;;  %p3774_p0 = scmp.lt.s32.totalorder %s4755_s20, %s3772_s17 }
  0x27   : > { %598 = vmatprep.mubr.bf16.mxu0 %v3831_v2  ;;  %p3775_p1 = scmp.lt.s32.totalorder %s3773_s15, %s3767_s29 }
  0x28   : > { %1191 = vmatpush1.bf16.msra.mxu1 %v3555_v60  ;;  %p3769_p12 = pnand %p3768_p11, %p3943_p5 }
  0x29   : > { %1192 = vmatprep.subr.bf16.mxu1 %v3556_v61  ;;  %p3776_p2 = por %p3775_p1, %p3774_p0 }
  0x2a   : > { %p3770_p13 = pneg %p3769_p12 }
  0x2c   : > { %1193 = vmatpush1.bf16.msra.mxu1 %v3558_v62  ;;  %p3777_p3 = pnand %p3776_p2, %p3770_p13 }
  0x2d   : > { %1194 = vmatprep.subr.bf16.mxu1 %v3559_v63 }
  0x2e   : > { %2966 = vmatmul.mubr.msk.bf16.vlgmr.msra.gmra.mrb[0].mxu0 %vm480_vm0, %v443_v19 }
  0x2f   : > { %657 = vmatpush1.bf16.msra.mxu0 %v3522_v18  ;;  %608 = vmatprep.mubr.bf16.mxu0 %v3831_v2 }
  0x30   : > { %658 = vmatprep.subr.bf16.mxu0 %v3527_v20  ;;  %1195 = vmatpush1.bf16.msra.mxu1 %v3561_v0 }
  0x31   : > { %1196 = vmatprep.subr.bf16.mxu1 %v3562_v1 }
  0x33   : > { %659 = vmatpush1.bf16.msra.mxu0 %v3525_v23 }
  0x34   : > { %754 = vmatprep.subr.bf16.mxu0 %v3530_v24  ;;  %1197 = vmatpush1.bf16.msra.mxu1 %v3564_v3 }
  0x35   : > { %1198 = vmatprep.subr.bf16.mxu1 %v3565_v41  ;;  %v3614_v41 = vld [vmem:[%s4799_s4 + $0x180] ss:$8 sps:$4 sm:$0xff]  }
  0x36   : > { %2967 = vmatmul.mubr.msk.bf16.gmra.mrb[4].mxu0 %vm480_vm0, %v444_v25 }
  0x37   : > { %688 = vmatprep.mubr.bf16.mxu0 %v3831_v2 }
  0x38   : > { %1199 = vmatpush1.bf16.msra.mxu1 %v3567_v42  ;;  %v3619_v42 = vld [vmem:[%s4799_s4 + $0x194] ss:$8 sps:$4 sm:$0xff]  }
  0x3e   : > { %2976 = vmatmul.mubr.msk.bf16.vlgmr.msra.gmra.mrb[0].mxu0 %vm480_vm0, %v623_v29 }
  0x3f   : > { %755 = vmatpush1.bf16.msra.mxu0 %v3528_v28  ;;  %698 = vmatprep.mubr.bf16.mxu0 %v3831_v2 }
  0x40   : > { %756 = vmatprep.subr.bf16.mxu0 %v3533_v30 }
  0x43   : > { %757 = vmatpush1.bf16.msra.mxu0 %v3531_v33 }
  0x44   : > { %852 = vmatprep.subr.bf16.mxu0 %v3536_v34 }
  0x46   : > { %2977 = vmatmul.mubr.msk.bf16.gmra.mrb[4].mxu0 %vm480_vm0, %v624_v35 }
  0x47   : > { %786 = vmatprep.mubr.bf16.mxu0 %v3831_v2 }
  0x4e   : > { %2986 = vmatmul.mubr.msk.bf16.vlgmr.msra.gmra.mrb[0].mxu0 %vm480_vm0, %v721_v39 }
  0x4f   : > { %853 = vmatpush1.bf16.msra.mxu0 %v3534_v38  ;;  %796 = vmatprep.mubr.bf16.mxu0 %v3831_v2 }
  0x50   : > { %854 = vmatprep.subr.bf16.mxu0 %v3539_v40  ;;  %v3540_v40 = vld [vmem:[%s4798_s3] sm:$0x7f]  }
  0x53   : > { %855 = vmatpush1.bf16.msra.mxu0 %v3537_v43  ;;  %v3568_v43 = vld [vmem:[%s4799_s4 + $0x13c] ss:$8 sps:$4 sm:$0xff]  }
  0x54   : > { %1200 = vmatprep.subr.bf16.mxu1 %v3568_v43  ;;  %v3617_v43 = vld [vmem:[%s4799_s4 + $0x190] ss:$8 sps:$4 sm:$0xff]  }
  0x56   : > { %2987 = vmatmul.mubr.msk.bf16.gmra.mrb[4].mxu0 %vm480_vm0, %v722_v44  ;;  %v3570_v44 = vld [vmem:[%s4799_s4 + $0x138] ss:$8 sps:$4 sm:$0xff]  }
  0x57   : > { %884 = vmatprep.mubr.bf16.mxu0 %v3831_v2  ;;  %1201 = vmatpush1.bf16.msra.mxu1 %v3570_v44  ;;  %v3622_v44 = vld [vmem:[%s4799_s4 + $0x1a4] ss:$8 sps:$4 sm:$0xff]  }
  0x58   : > { %3044 = vmatprep.subr.msk.bf16.mxu1 %vm1175_vm3, %v3043_v46  ;;  %v3625_v46 = vld [vmem:[%s4799_s4 + $0x1b4] ss:$8 sps:$4 sm:$0xff]  }
  0x5e   : > { %2996 = vmatmul.mubr.msk.bf16.vlgmr.msra.gmra.mrb[0].mxu0 %vm480_vm0, %v819_v47  ;;  %v3042_v47 = vcombine.low %v3021_v45, %v3021_v45  ;;  %v3620_v45 = vld [vmem:[%s4799_s4 + $0x1a0] ss:$8 sps:$4 sm:$0xff]  }
  0x5f   : > { %894 = vmatprep.mubr.bf16.mxu0 %v3831_v2 }
  0x60   : > { %v1177_v48 = vsel %vm1175_vm3, %v3042_v47, 0  ;;  %v3623_v47 = vld [vmem:[%s4799_s4 + $0x1b0] ss:$8 sps:$4 sm:$0xff]  }
  0x61   : > { %1203 = vmatpush1.bf16.msra.mxu1 %v1177_v48  ;;  %v3628_v48 = vld [vmem:[%s4799_s4 + $0x1c4] ss:$8 sps:$4 sm:$0xff]  }
  0x62   : > { %1338 = vmatprep.subr.bf16.mxu1 %v3575_v49  ;;  %v3626_v49 = vld [vmem:[%s4799_s4 + $0x1c0] ss:$8 sps:$4 sm:$0xff]  }
  0x66   : > { %2997 = vmatmul.mubr.msk.bf16.gmra.mrb[4].mxu0 %vm480_vm0, %v820_v50 }
  0x67   : > { %995 = vmatprep.mubr.bf16.mxu0 %v3831_v2 }
 0x131   : > { %v886_v11 = vpop.f32.mrb[0].mxu0 }
 0x132   : > { %v925_v12 = vadd.f32 %v918_v9, %v886_v11  ;;  %v888_v13 = vpop.f32.mrb[1].mxu0  ;;  %v3578_v11 = vld [vmem:[%s4799_s4 + $0x14] ss:$8 sps:$4 sm:$0xff]  }
 0x133   : > { %v926_v14 = vadd.f32 %v922_v10, %v888_v13  ;;  %v890_v15 = vpop.f32.mrb[2].mxu0  ;;  %v3581_v13 = vld [vmem:[%s4799_s4 + $0x24] ss:$8 sps:$4 sm:$0xff]  }
 0x134   : > { %v927_v16 = vadd.f32 %v918_v9, %v890_v15  ;;  %v892_v17 = vpop.f32.mrb[3].mxu0  ;;  %v933_v19 = vmax.f32 %v925_v12, 0.0  ;;  %v3576_v12 = vld [vmem:[%s4799_s4 + $0x10] ss:$8 sps:$4 sm:$0xff]   ;;  %v3584_v15 = vld [vmem:[%s4799_s4 + $0x34] ss:$8 sps:$4 sm:$0xff]  }
 0x135   : > { %v928_v18 = vadd.f32 %v922_v10, %v892_v17  ;;  %v934_v21 = vmax.f32 %v926_v14, 0.0  ;;  %v3579_v14 = vld [vmem:[%s4799_s4 + $0x20] ss:$8 sps:$4 sm:$0xff]   ;;  %v3587_v17 = vld [vmem:[%s4799_s4 + $0x44] ss:$8 sps:$4 sm:$0xff]  }
 0x136   : > { %v935_v20 = vmax.f32 %v927_v16, 0.0  ;;  %v3582_v16 = vld [vmem:[%s4799_s4 + $0x30] ss:$8 sps:$4 sm:$0xff]  }
 0x137   : > { %v936_v22 = vmax.f32 %v928_v18, 0.0  ;;  %v3585_v18 = vld [vmem:[%s4799_s4 + $0x40] ss:$8 sps:$4 sm:$0xff]  }
 0x138   : > { %v943_v23 = vpack.c.bf16 %v935_v20, %v933_v19  ;;  %v3590_v19 = vld [vmem:[%s4799_s4 + $0x54] ss:$8 sps:$4 sm:$0xff]   ;;  %v3588_v20 = vld [vmem:[%s4799_s4 + $0x50] ss:$8 sps:$4 sm:$0xff]  }
 0x139   : > { %v944_v24 = vpack.c.bf16 %v936_v22, %v934_v21  ;;  %v896_v25 = vpop.f32.mrb[4].mxu0  ;;  %v3593_v21 = vld [vmem:[%s4799_s4 + $0x64] ss:$8 sps:$4 sm:$0xff]   ;;  %v3591_v22 = vld [vmem:[%s4799_s4 + $0x60] ss:$8 sps:$4 sm:$0xff]  }
 0x13a   : > { %v929_v26 = vadd.f32 %v918_v9, %v896_v25  ;;  %v898_v27 = vpop.f32.mrb[5].mxu0  ;;  %v3599_v25 = vld [vmem:[%s4799_s4 + $0x84] ss:$8 sps:$4 sm:$0xff]  }
 0x13b   : > { %v930_v28 = vadd.f32 %v922_v10, %v898_v27  ;;  %v900_v29 = vpop.f32.mrb[6].mxu0  ;;  %963 = vmatprep.subr.bf16.mxu0 %v944_v24  ;;  %v3594_v24 = vld [vmem:[%s4799_s4 + $0x70] ss:$8 sps:$4 sm:$0xff]   ;;  %v3602_v27 = vld [vmem:[%s4799_s4 + $0x94] ss:$8 sps:$4 sm:$0xff]  }
 0x13c   : > { %v931_v30 = vadd.f32 %v918_v9, %v900_v29  ;;  %v902_v31 = vpop.f32.mrb[7].mxu0  ;;  %964 = vmatpush1.bf16.msra.mxu0 %v943_v23  ;;  %v937_v33 = vmax.f32 %v929_v26, 0.0  ;;  %v3596_v23 = vld [vmem:[%s4799_s4 + $0x74] ss:$8 sps:$4 sm:$0xff]   ;;  %v3597_v26 = vld [vmem:[%s4799_s4 + $0x80] ss:$8 sps:$4 sm:$0xff]  }
 0x13d   : > { %v932_v32 = vadd.f32 %v922_v10, %v902_v31  ;;  %v938_v35 = vmax.f32 %v930_v28, 0.0  ;;  %v1028_v28 = vld [vmem:[%s4799_s4 + $0xa0] sm:$0xff]  ;;  %v3600_v29 = vld [vmem:[%s4799_s4 + $0x90] ss:$8 sps:$4 sm:$0xff]  }
 0x13e   : > { %v939_v34 = vmax.f32 %v931_v30, 0.0  ;;  %v3067_v30 = vcombine.high %v1028_v28, %v1028_v28  ;;  %v3066_v31 = vcombine.low %v1028_v28, %v1028_v28  ;;  %v3671_v28 = vld [vmem:[%s4799_s4 + $0x2a4] ss:$8 sps:$4 sm:$0xff]  }
 0x13f   : > { %v940_v36 = vmax.f32 %v932_v32, 0.0 }
 0x140   : > { %v945_v37 = vpack.c.bf16 %v939_v34, %v937_v33  ;;  %v1333_v32 = vsel %vm1175_vm3, %v3066_v31, 0  ;;  %v3607_v33 = vld [vmem:[%s4799_s4 + $0x154] ss:$8 sps:$4 sm:$0xff]   ;;  %v3605_v34 = vld [vmem:[%s4799_s4 + $0x150] ss:$8 sps:$4 sm:$0xff]  }
 0x141   : > { %v946_v38 = vpack.c.bf16 %v940_v36, %v938_v35  ;;  %v3610_v35 = vld [vmem:[%s4799_s4 + $0x164] ss:$8 sps:$4 sm:$0xff]  }
 0x142   : > { %v958_v39 = vsel %vm956_vm1, %v945_v37, 0  ;;  %v3608_v37 = vld [vmem:[%s4799_s4 + $0x160] ss:$8 sps:$4 sm:$0xff]  }
 0x143   : > { %2999 = vmatprep.subr.msk.bf16.mxu0 %vm956_vm1, %v946_v38  ;;  %v3613_v38 = vld [vmem:[%s4799_s4 + $0x174] ss:$8 sps:$4 sm:$0xff]  }
 0x144   : > { %966 = vmatpush1.bf16.msra.mxu0 %v958_v39  ;;  %v3611_v39 = vld [vmem:[%s4799_s4 + $0x170] ss:$8 sps:$4 sm:$0xff]  }
 0x147   : > { %3000 = vmatmul.mubr.msk.bf16.vlgmr.msra.gmra.mrb[8].mxu0 %vm952_vm2, %v3540_v40  ;;  %v3616_v40 = vld [vmem:[%s4799_s4 + $0x184] ss:$8 sps:$4 sm:$0xff]  }
 0x148   : > { %2011 = vmatprep.mubr.bf16.mxu0 %v3831_v2 }
 0x21a   : > { %v997_v50 = vpop.f32.mrb[8].mxu0 }
 0x21b   : > { %v999_v51 = vpop.f32.mrb[9].mxu0 }
 0x21c   : > { %v1001_v52 = vpop.f32.mrb[10].mxu0 }
 0x21d   : > { %v4144_v53 = vpack.c.bf16 %v1001_v52, %v997_v50  ;;  %v1003_v54 = vpop.f32.mrb[11].mxu0  ;;  %v3631_v50 = vld [vmem:[%s4799_s4 + $0x1d4] ss:$8 sps:$4 sm:$0xff]   ;;  %v3634_v52 = vld [vmem:[%s4799_s4 + $0x1e4] ss:$8 sps:$4 sm:$0xff]  }
 0x21e   : > { %v4146_v55 = vpack.c.bf16 %v1003_v54, %v999_v51  ;;  %v3629_v51 = vld [vmem:[%s4799_s4 + $0x1d0] ss:$8 sps:$4 sm:$0xff]  }
 0x21f   : > { %v1052_v56 = vshrl.u32 %v4144_v53, 16  ;;  %v1054_v57 = vshll.u32 %v4144_v53, 16  ;;  %v3090_v54 = vld [vmem:[%s4799_s4 + $0x1f0] sm:$0xff] }
 0x220   : > { %v1059_v58 = vshrl.u32 %v4146_v55, 16  ;;  %v1061_v59 = vshll.u32 %v4146_v55, 16  ;;  %v1406_v36 = vrot.slane %v4146_v55, 1  ;;  %v1782_v31 = vrot.slane %v4146_v55, 2 }
 0x221   : > { %v1056_v60 = vrot.slane %v1054_v57, 1  ;;  %v4152_v61 = vrot.slane %v1052_v56, 1  ;;  %v4154_v62 = vrot.slane %v1054_v57, 2  ;;  %v3112_v57 = vcombine.high %v3090_v54, %v3090_v54 }
 0x222   : > { %v1063_v63 = vrot.slane %v1061_v59, 1  ;;  %v4156_v0 = vrot.slane %v1059_v58, 1  ;;  %v4158_v1 = vrot.slane %v1061_v59, 2 }
 0x223   : > { %v1593_v3 = vor.u32 %v4154_v62, %v4152_v61  ;;  %v1057_v10 = vor.u32 %v1056_v60, %v1052_v56  ;;  %v3632_v56 = vld [vmem:[%s4799_s4 + $0x1e0] ss:$8 sps:$4 sm:$0xff]   ;;  %v3639_v60 = vld [vmem:[%s4799_s4 + $0x1fc] ss:$8 sps:$4 sm:$0xff]   ;;  %v3678_v62 = vld [vmem:[%s4799_s4 + $0x2d0] ss:$8 sps:$4 sm:$0xff]  }
 0x224   : > { %v1064_v4 = vor.u32 %v1063_v63, %v1059_v58  ;;  %v1596_v9 = vor.u32 %v4158_v1, %v4156_v0  ;;  %v3111_v58 = vcombine.low %v3090_v54, %v3090_v54  ;;  %v3637_v63 = vld [vmem:[%s4799_s4 + $0x1f8] ss:$8 sps:$4 sm:$0xff]   ;;  %v3648_v0 = vld [vmem:[%s4799_s4 + $0x22c] ss:$8 sps:$4 sm:$0xff]   ;;  %v3646_v1 = vld [vmem:[%s4799_s4 + $0x228] ss:$8 sps:$4 sm:$0xff]  }
 0x225   : > { %v3680_v61 = vld [vmem:[%s4799_s4 + $0x2d4] ss:$8 sps:$4 sm:$0xff]   ;;  %v3710_v54 = vld [vmem:[%s4802_s7 + $0x160] sm:$0xff]  }
 0x226   : > { %3045 = vmatprep.mubr.msk.bf16.mxu1 %vm1171_vm4, %v1064_v4  ;;  %v1517_v59 = vsel %vm1175_vm3, %v3111_v58, 0  ;;  %v1405_v4 = vrot.slane %v4144_v53, 1  ;;  %v3716_v58 = vld [vmem:[%s4802_s7 + $0x178] sm:$0xff]  }
 0x227   : > { %1215 = vmatmul.mubr.bf16.vlgmr.msra.gmra.mrb[0].mxu1 %v1057_v10  ;;  %v3640_v10 = vld [vmem:[%s4799_s4 + $0x208] ss:$8 sps:$4 sm:$0xff]  }
 0x228   : > { %1339 = vmatpush1.bf16.msra.mxu1 %v3573_v7  ;;  %3069 = vmatprep.mubr.msk.bf16.mxu1 %vm1171_vm4, %v4146_v55  ;;  %v3642_v7 = vld [vmem:[%s4799_s4 + $0x20c] ss:$8 sps:$4 sm:$0xff]   ;;  %v3675_v55 = vld [vmem:[%s4799_s4 + $0x2c0] ss:$8 sps:$4 sm:$0xff]  }
 0x229   : > { %1340 = vmatprep.subr.bf16.mxu1 %v3578_v11  ;;  %v3645_v11 = vld [vmem:[%s4799_s4 + $0x21c] ss:$8 sps:$4 sm:$0xff]  }
 0x22c   : > { %1341 = vmatpush1.bf16.msra.mxu1 %v3576_v12  ;;  %v3643_v12 = vld [vmem:[%s4799_s4 + $0x218] ss:$8 sps:$4 sm:$0xff]  }
 0x22d   : > { %1342 = vmatprep.subr.bf16.mxu1 %v3581_v13  ;;  %v3649_v13 = vld [vmem:[%s4799_s4 + $0x238] ss:$8 sps:$4 sm:$0xff]  }
 0x230   : > { %1343 = vmatpush1.bf16.msra.mxu1 %v3579_v14  ;;  %v3654_v14 = vld [vmem:[%s4799_s4 + $0x24c] ss:$8 sps:$4 sm:$0xff]  }
 0x231   : > { %1344 = vmatprep.subr.bf16.mxu1 %v3584_v15  ;;  %v3652_v15 = vld [vmem:[%s4799_s4 + $0x248] ss:$8 sps:$4 sm:$0xff]  }
 0x234   : > { %1345 = vmatpush1.bf16.msra.mxu1 %v3582_v16  ;;  %v3657_v16 = vld [vmem:[%s4799_s4 + $0x25c] ss:$8 sps:$4 sm:$0xff]  }
 0x235   : > { %1346 = vmatprep.subr.bf16.mxu1 %v3587_v17  ;;  %v3655_v17 = vld [vmem:[%s4799_s4 + $0x258] ss:$8 sps:$4 sm:$0xff]  }
 0x238   : > { %1347 = vmatpush1.bf16.msra.mxu1 %v3585_v18  ;;  %v3660_v18 = vld [vmem:[%s4799_s4 + $0x26c] ss:$8 sps:$4 sm:$0xff]  }
 0x239   : > { %1348 = vmatprep.subr.bf16.mxu1 %v3590_v19  ;;  %v3658_v19 = vld [vmem:[%s4799_s4 + $0x268] ss:$8 sps:$4 sm:$0xff]  }
 0x23c   : > { %1349 = vmatpush1.bf16.msra.mxu1 %v3588_v20  ;;  %v3663_v20 = vld [vmem:[%s4799_s4 + $0x27c] ss:$8 sps:$4 sm:$0xff]  }
 0x23d   : > { %1350 = vmatprep.subr.bf16.mxu1 %v3593_v21  ;;  %v3661_v21 = vld [vmem:[%s4799_s4 + $0x278] ss:$8 sps:$4 sm:$0xff]  }
 0x240   : > { %1351 = vmatpush1.bf16.msra.mxu1 %v3591_v22  ;;  %v3666_v22 = vld [vmem:[%s4799_s4 + $0x28c] ss:$8 sps:$4 sm:$0xff]  }
 0x241   : > { %1352 = vmatprep.subr.bf16.mxu1 %v3596_v23  ;;  %v3135_v23 = vld [vmem:[%s4799_s4 + $0x298] sm:$0xff] }
 0x244   : > { %1353 = vmatpush1.bf16.msra.mxu1 %v3594_v24  ;;  %v3664_v24 = vld [vmem:[%s4799_s4 + $0x288] ss:$8 sps:$4 sm:$0xff]  }
 0x245   : > { %1354 = vmatprep.subr.bf16.mxu1 %v3599_v25  ;;  %v3157_v25 = vcombine.high %v3135_v23, %v3135_v23 }
 0x248   : > { %1355 = vmatpush1.bf16.msra.mxu1 %v3597_v26  ;;  %v3156_v26 = vcombine.low %v3135_v23, %v3135_v23  ;;  %v3711_v23 = vld [vmem:[%s4802_s7 + $0x78] sm:$0xff]  }
 0x249   : > { %1356 = vmatprep.subr.bf16.mxu1 %v3602_v27 }
 0x24a   : > { %v1707_v27 = vsel %vm1175_vm3, %v3156_v26, 0  ;;  %v3717_v26 = vld [vmem:[%s4802_s7 + $0x90] sm:$0xff]  }
 0x24c   : > { %1357 = vmatpush1.bf16.msra.mxu1 %v3600_v29  ;;  %v3669_v29 = vld [vmem:[%s4799_s4 + $0x2a0] ss:$8 sps:$4 sm:$0xff]  }
 0x24d   : > { %3068 = vmatprep.subr.msk.bf16.mxu1 %vm1175_vm3, %v3067_v30  ;;  %v3674_v30 = vld [vmem:[%s4799_s4 + $0x2b4] ss:$8 sps:$4 sm:$0xff]  }
 0x250   : > { %1359 = vmatpush1.bf16.msra.mxu1 %v1333_v32  ;;  %v3672_v32 = vld [vmem:[%s4799_s4 + $0x2b0] ss:$8 sps:$4 sm:$0xff]  }
 0x251   : > { %1522 = vmatprep.subr.bf16.mxu1 %v3607_v33  ;;  %v3677_v33 = vld [vmem:[%s4799_s4 + $0x2c4] ss:$8 sps:$4 sm:$0xff]  }
 0x253   : > { %1371 = vmatmul.mubr.bf16.vlgmr.msra.gmra.mrb[0].mxu1 %v4144_v53 }
 0x254   : > { %1523 = vmatpush1.bf16.msra.mxu1 %v3605_v34  ;;  %3114 = vmatprep.mubr.msk.bf16.mxu1 %vm1171_vm4, %v1406_v36  ;;  %v3681_v34 = vld [vmem:[%s4799_s4 + $0x2e0] ss:$8 sps:$4 sm:$0xff]   ;;  %v3684_v36 = vld [vmem:[%s4799_s4 + $0x2f0] ss:$8 sps:$4 sm:$0xff]  }
 0x255   : > { %1524 = vmatprep.subr.bf16.mxu1 %v3610_v35  ;;  %v3686_v35 = vld [vmem:[%s4799_s4 + $0x2f4] ss:$8 sps:$4 sm:$0xff]  }
 0x258   : > { %1525 = vmatpush1.bf16.msra.mxu1 %v3608_v37  ;;  %v3689_v37 = vld [vmem:[%s4799_s4 + $0x304] ss:$8 sps:$4 sm:$0xff]  }
 0x259   : > { %1526 = vmatprep.subr.bf16.mxu1 %v3613_v38  ;;  %v3687_v38 = vld [vmem:[%s4799_s4 + $0x300] ss:$8 sps:$4 sm:$0xff]  }
 0x25c   : > { %1527 = vmatpush1.bf16.msra.mxu1 %v3611_v39  ;;  %v3692_v39 = vld [vmem:[%s4799_s4 + $0x314] ss:$8 sps:$4 sm:$0xff]  }
 0x25d   : > { %1528 = vmatprep.subr.bf16.mxu1 %v3616_v40  ;;  %v3690_v40 = vld [vmem:[%s4799_s4 + $0x310] ss:$8 sps:$4 sm:$0xff]  }
 0x260   : > { %1529 = vmatpush1.bf16.msra.mxu1 %v3614_v41  ;;  %v3695_v41 = vld [vmem:[%s4799_s4 + $0x324] ss:$8 sps:$4 sm:$0xff]  }
 0x261   : > { %1530 = vmatprep.subr.bf16.mxu1 %v3619_v42  ;;  %v3693_v42 = vld [vmem:[%s4799_s4 + $0x320] ss:$8 sps:$4 sm:$0xff]  }
 0x264   : > { %1531 = vmatpush1.bf16.msra.mxu1 %v3617_v43  ;;  %v3698_v43 = vld [vmem:[%s4799_s4 + $0x334] ss:$8 sps:$4 sm:$0xff]  }
 0x265   : > { %1532 = vmatprep.subr.bf16.mxu1 %v3622_v44  ;;  %v3180_v44 = vld [vmem:[%s4799_s4 + $0x340] sm:$0xff] }
 0x268   : > { %1533 = vmatpush1.bf16.msra.mxu1 %v3620_v45  ;;  %v3696_v45 = vld [vmem:[%s4799_s4 + $0x330] ss:$8 sps:$4 sm:$0xff]  }
 0x269   : > { %1534 = vmatprep.subr.bf16.mxu1 %v3625_v46  ;;  %v3202_v46 = vcombine.high %v3180_v44, %v3180_v44 }
 0x26c   : > { %1535 = vmatpush1.bf16.msra.mxu1 %v3623_v47  ;;  %v3201_v47 = vcombine.low %v3180_v44, %v3180_v44  ;;  %v3729_v44 = vld [vmem:[%s4802_s7 + $0x40] sm:$0xff]  }
 0x26d   : > { %1536 = vmatprep.subr.bf16.mxu1 %v3628_v48 }
 0x26e   : > { %v1893_v48 = vsel %vm1175_vm3, %v3201_v47, 0 }
 0x270   : > { %1537 = vmatpush1.bf16.msra.mxu1 %v3626_v49  ;;  %v1781_v49 = vrot.slane %v4144_v53, 2  ;;  %v3706_v53 = vld [vmem:[%s4802_s7 + $0x150] sm:$0xff]  }
 0x271   : > { %1538 = vmatprep.subr.bf16.mxu1 %v3631_v50  ;;  %v3702_v50 = vld [vmem:[%s4802_s7 + $0x140] sm:$0xff]  }
 0x274   : > { %1539 = vmatpush1.bf16.msra.mxu1 %v3629_v51  ;;  %v3704_v51 = vld [vmem:[%s4802_s7 + $0x148] sm:$0xff]  }
 0x275   : > { %1540 = vmatprep.subr.bf16.mxu1 %v3634_v52  ;;  %v3708_v52 = vld [vmem:[%s4802_s7 + $0x158] sm:$0xff]  }
 0x278   : > { %1541 = vmatpush1.bf16.msra.mxu1 %v3632_v56  ;;  %v3712_v56 = vld [vmem:[%s4802_s7 + $0x168] sm:$0xff]  }
 0x279   : > { %3113 = vmatprep.subr.msk.bf16.mxu1 %vm1175_vm3, %v3112_v57  ;;  %v3714_v57 = vld [vmem:[%s4802_s7 + $0x170] sm:$0xff]  }
 0x27c   : > { %1543 = vmatpush1.bf16.msra.mxu1 %v1517_v59  ;;  %v1945_v59 = vld [vmem:[%s4800_s5] sm:$0x3] }
 0x27d   : > { %1712 = vmatprep.subr.bf16.mxu1 %v3639_v60  ;;  %v1950_v60 = vrot.slane %v1945_v59, %v917_v6  ;;  %v3701_v6 = vld [vmem:[%s4802_s7 + $0x50] sm:$0xff]  }
 0x27f   : > { %1555 = vmatmul.mubr.bf16.vlgmr.msra.gmra.mrb[0].mxu1 %v1405_v4 }
 0x280   : > { %1713 = vmatpush1.bf16.msra.mxu1 %v3637_v63  ;;  %3159 = vmatprep.mubr.msk.bf16.mxu1 %vm1171_vm4, %v1596_v9  ;;  %v3651_v9 = vld [vmem:[%s4799_s4 + $0x23c] ss:$8 sps:$4 sm:$0xff]   ;;  %v1954_v63 = vrot.slane %v1945_v59, %v921_v8 }
 0x281   : > { %1714 = vmatprep.subr.bf16.mxu1 %v3642_v7  ;;  %v3703_v8 = vld [vmem:[%s4802_s7 + $0x58] sm:$0xff]  }
 0x284   : > { %1715 = vmatpush1.bf16.msra.mxu1 %v3640_v10 }
 0x285   : > { %1716 = vmatprep.subr.bf16.mxu1 %v3645_v11 }
 0x288   : > { %1717 = vmatpush1.bf16.msra.mxu1 %v3643_v12 }
 0x289   : > { %1718 = vmatprep.subr.bf16.mxu1 %v3648_v0 }
 0x28c   : > { %1719 = vmatpush1.bf16.msra.mxu1 %v3646_v1 }
 0x28d   : > { %1720 = vmatprep.subr.bf16.mxu1 %v3651_v9 }
 0x290   : > { %1721 = vmatpush1.bf16.msra.mxu1 %v3649_v13 }
 0x291   : > { %1722 = vmatprep.subr.bf16.mxu1 %v3654_v14 }
 0x294   : > { %1723 = vmatpush1.bf16.msra.mxu1 %v3652_v15 }
 0x295   : > { %1724 = vmatprep.subr.bf16.mxu1 %v3657_v16 }
 0x298   : > { %1725 = vmatpush1.bf16.msra.mxu1 %v3655_v17 }
 0x299   : > { %1726 = vmatprep.subr.bf16.mxu1 %v3660_v18 }
 0x29c   : > { %1727 = vmatpush1.bf16.msra.mxu1 %v3658_v19 }
 0x29d   : > { %1728 = vmatprep.subr.bf16.mxu1 %v3663_v20  ;;  %v3705_v20 = vld [vmem:[%s4802_s7 + $0x60] sm:$0xff]  }
 0x2a0   : > { %1729 = vmatpush1.bf16.msra.mxu1 %v3661_v21  ;;  %v3707_v21 = vld [vmem:[%s4802_s7 + $0x68] sm:$0xff]  }
 0x2a1   : > { %1730 = vmatprep.subr.bf16.mxu1 %v3666_v22  ;;  %v3709_v22 = vld [vmem:[%s4802_s7 + $0x70] sm:$0xff]  }
 0x2a4   : > { %1731 = vmatpush1.bf16.msra.mxu1 %v3664_v24  ;;  %v3713_v24 = vld [vmem:[%s4802_s7 + $0x80] sm:$0xff]  }
 0x2a5   : > { %3158 = vmatprep.subr.msk.bf16.mxu1 %vm1175_vm3, %v3157_v25  ;;  %v3715_v25 = vld [vmem:[%s4802_s7 + $0x88] sm:$0xff]  }
 0x2a8   : > { %1733 = vmatpush1.bf16.msra.mxu1 %v1707_v27  ;;  %v3718_v27 = vld [vmem:[%s4802_s7 + $0x180] sm:$0xff]  }
 0x2a9   : > { %1898 = vmatprep.subr.bf16.mxu1 %v3671_v28  ;;  %v3719_v28 = vld [vmem:[%s4802_s7 + $0x98] sm:$0xff]  }
 0x2ab   : > { %1745 = vmatmul.mubr.bf16.vlgmr.msra.gmra.mrb[0].mxu1 %v1593_v3  ;;  %v3683_v3 = vld [vmem:[%s4799_s4 + $0x2e4] ss:$8 sps:$4 sm:$0xff]  }
 0x2ac   : > { %1899 = vmatpush1.bf16.msra.mxu1 %v3669_v29  ;;  %3204 = vmatprep.mubr.msk.bf16.mxu1 %vm1171_vm4, %v1782_v31  ;;  %v3720_v29 = vld [vmem:[%s4802_s7 + $0x188] sm:$0xff]  }
 0x2ad   : > { %1900 = vmatprep.subr.bf16.mxu1 %v3674_v30 }
 0x2b0   : > { %1901 = vmatpush1.bf16.msra.mxu1 %v3672_v32 }
 0x2b1   : > { %1902 = vmatprep.subr.bf16.mxu1 %v3677_v33 }
 0x2b4   : > { %1903 = vmatpush1.bf16.msra.mxu1 %v3675_v55 }
 0x2b5   : > { %1904 = vmatprep.subr.bf16.mxu1 %v3680_v61 }
 0x2b8   : > { %1905 = vmatpush1.bf16.msra.mxu1 %v3678_v62 }
 0x2b9   : > { %1906 = vmatprep.subr.bf16.mxu1 %v3683_v3 }
 0x2bc   : > { %1907 = vmatpush1.bf16.msra.mxu1 %v3681_v34  ;;  %v3721_v34 = vld [vmem:[%s4802_s7] sm:$0xff]  }
 0x2bd   : > { %1908 = vmatprep.subr.bf16.mxu1 %v3686_v35 }
 0x2c0   : > { %1909 = vmatpush1.bf16.msra.mxu1 %v3684_v36 }
 0x2c1   : > { %1910 = vmatprep.subr.bf16.mxu1 %v3689_v37  ;;  %v3722_v37 = vld [vmem:[%s4802_s7 + $0x8] sm:$0xff]  }
 0x2c4   : > { %1911 = vmatpush1.bf16.msra.mxu1 %v3687_v38  ;;  %v3723_v38 = vld [vmem:[%s4802_s7 + $0x10] sm:$0xff]  }
 0x2c5   : > { %1912 = vmatprep.subr.bf16.mxu1 %v3692_v39  ;;  %v3724_v39 = vld [vmem:[%s4802_s7 + $0x18] sm:$0xff]  }
 0x2c8   : > { %1913 = vmatpush1.bf16.msra.mxu1 %v3690_v40  ;;  %v3725_v40 = vld [vmem:[%s4802_s7 + $0x20] sm:$0xff]  }
 0x2c9   : > { %1914 = vmatprep.subr.bf16.mxu1 %v3695_v41  ;;  %v3726_v41 = vld [vmem:[%s4802_s7 + $0x28] sm:$0xff]  }
 0x2cc   : > { %1915 = vmatpush1.bf16.msra.mxu1 %v3693_v42  ;;  %v3727_v42 = vld [vmem:[%s4802_s7 + $0x30] sm:$0xff]  }
 0x2cd   : > { %1916 = vmatprep.subr.bf16.mxu1 %v3698_v43  ;;  %v3728_v43 = vld [vmem:[%s4802_s7 + $0x38] sm:$0xff]  }
 0x2d0   : > { %1917 = vmatpush1.bf16.msra.mxu1 %v3696_v45  ;;  %v3730_v45 = vld [vmem:[%s4802_s7 + $0x48] sm:$0xff]  }
 0x2d1   : > { %3203 = vmatprep.subr.msk.bf16.mxu1 %vm1175_vm3, %v3202_v46  ;;  %v3731_v46 = vld [vmem:[%s4802_s7 + $0xa0] sm:$0xff]  }
 0x2d4   : > { %1919 = vmatpush1.bf16.msra.mxu1 %v1893_v48  ;;  %v3732_v48 = vld [vmem:[%s4802_s7 + $0xa8] sm:$0xff]  }
 0x2d5   : > { %2620 = vmatprep.subr.bf16.mxu1 %v3831_v2 }
 0x2d7   : > { %1931 = vmatmul.mubr.bf16.vlgmr.msra.gmra.mrb[0].mxu1 %v1781_v49  ;;  %v3733_v49 = vld [vmem:[%s4802_s7 + $0xb0] sm:$0xff]  }
 0x2d8   : > { %2621 = vmatpush1.bf16.msra.mxu1 %v3702_v50  ;;  %v3734_v50 = vld [vmem:[%s4802_s7 + $0xb8] sm:$0xff]  }
 0x2d9   : > { %2622 = vmatprep.subr.bf16.mxu1 %v3831_v2 }
 0x2dc   : > { %2623 = vmatpush1.bf16.msra.mxu1 %v3704_v51  ;;  %v3735_v51 = vld [vmem:[%s4802_s7 + $0xc0] sm:$0xff]  }
 0x2dd   : > { %2624 = vmatprep.subr.bf16.mxu1 %v3831_v2 }
 0x2e0   : > { %2625 = vmatpush1.bf16.msra.mxu1 %v3706_v53  ;;  %v3736_v53 = vld [vmem:[%s4802_s7 + $0xc8] sm:$0xff]  }
 0x2e1   : > { %2626 = vmatprep.subr.bf16.mxu1 %v3831_v2 }
 0x2e4   : > { %2627 = vmatpush1.bf16.msra.mxu1 %v3708_v52  ;;  %v3737_v52 = vld [vmem:[%s4802_s7 + $0xd0] sm:$0xff]  }
 0x2e5   : > { %2628 = vmatprep.subr.bf16.mxu1 %v3831_v2 }
 0x2e8   : > { %2629 = vmatpush1.bf16.msra.mxu1 %v3710_v54  ;;  %v3738_v54 = vld [vmem:[%s4802_s7 + $0xd8] sm:$0xff]  }
 0x2e9   : > { %2630 = vmatprep.subr.bf16.mxu1 %v3831_v2 }
 0x2ec   : > { %2631 = vmatpush1.bf16.msra.mxu1 %v3712_v56  ;;  %v3739_v56 = vld [vmem:[%s4802_s7 + $0xe0] sm:$0xff]  }
 0x2ed   : > { %2632 = vmatprep.subr.bf16.mxu1 %v3831_v2 }
 0x2f0   : > { %2633 = vmatpush1.bf16.msra.mxu1 %v3714_v57  ;;  %v3740_v57 = vld [vmem:[%s4802_s7 + $0xe8] sm:$0xff]  }
 0x2f1   : > { %2634 = vmatprep.subr.bf16.mxu1 %v3831_v2 }
 0x2f4   : > { %2635 = vmatpush1.bf16.msra.mxu1 %v3716_v58  ;;  %v3741_v58 = vld [vmem:[%s4802_s7 + $0xf0] sm:$0xff]  }
 0x2f5   : > { %2636 = vmatprep.subr.bf16.mxu1 %v3831_v2 }
 0x2f8   : > { %2637 = vmatpush1.bf16.msra.mxu1 %v3718_v27  ;;  %v3759_v27 = vld [vmem:[%s4806_s11] sm:$0xff]  }
 0x2f9   : > { %2638 = vmatprep.subr.bf16.mxu1 %v3831_v2 }
 0x2fc   : > { %2639 = vmatpush1.bf16.msra.mxu1 %v3720_v29  ;;  %v3761_v29 = vld [vmem:[%s4806_s11 + $0x10] sm:$0xff]  }
 0x3aa   : > { %v1932_v4 = vpop.f32.mrb[0].mxu1 }
 0x3ab   : > { %v1957_v7 = vadd.f32 %v1950_v60, %v1932_v4  ;;  %v1934_v10 = vpop.f32.mrb[1].mxu1  ;;  %v3743_v4 = vld [vmem:[%s4802_s7 + $0x100] sm:$0xff]  }
 0x3ac   : > { %v1958_v11 = vadd.f32 %v1954_v63, %v1934_v10  ;;  %v1936_v12 = vpop.f32.mrb[2].mxu1  ;;  %v3745_v10 = vld [vmem:[%s4802_s7 + $0x110] sm:$0xff]  }
 0x3ad   : > { %v1959_v0 = vadd.f32 %v1950_v60, %v1936_v12  ;;  %v1938_v1 = vpop.f32.mrb[3].mxu1  ;;  %v1961_v13 = vmax.f32 %v1957_v7, 0.0  ;;  %v3744_v7 = vld [vmem:[%s4802_s7 + $0x108] sm:$0xff]   ;;  %v3747_v12 = vld [vmem:[%s4802_s7 + $0x120] sm:$0xff]  }
 0x3ae   : > { %v1960_v9 = vadd.f32 %v1954_v63, %v1938_v1  ;;  %v1962_v15 = vmax.f32 %v1958_v11, 0.0  ;;  %v3742_v63 = vld [vmem:[%s4802_s7 + $0xf8] sm:$0xff]   ;;  %v3749_v1 = vld [vmem:[%s4802_s7 + $0x130] sm:$0xff]  }
 0x3af   : > { %v1963_v14 = vmax.f32 %v1959_v0, 0.0  ;;  %v3746_v11 = vld [vmem:[%s4802_s7 + $0x118] sm:$0xff]   ;;  %v3748_v0 = vld [vmem:[%s4802_s7 + $0x128] sm:$0xff]  }
 0x3b0   : > { %v1964_v16 = vmax.f32 %v1960_v9, 0.0  ;;  %v3750_v9 = vld [vmem:[%s4802_s7 + $0x138] sm:$0xff]  }
 0x3b1   : > { %v1966_v17 = vpack.c.bf16 %v1963_v14, %v1961_v13  ;;  %v3751_v14 = vld [vmem:[%s4804_s9] sm:$0xff]  }
 0x3b2   : > { %v1967_v18 = vpack.c.bf16 %v1964_v16, %v1962_v15  ;;  %v3832_v15 = vmov 0.0   ;;  %v3752_v16 = vld [vmem:[%s4804_s9 + $0x8] sm:$0xff]  }
 0x3b3   : > { %v1974_v19 = vsel %vm1972_vm5, %v1966_v17, 0  ;;  %3400 = vmatprep.subr.bf16.mxu1 %v3832_v15  ;;  %v3754_v17 = vld [vmem:[%s4804_s9 + $0x18] sm:$0xff]  }
 0x3b4   : > { %3205 = vmatprep.subr.msk.bf16.mxu0 %vm1972_vm5, %v1967_v18  ;;  %v3755_v18 = vld [vmem:[%s4804_s9 + $0x20] sm:$0xff]  }
 0x3b5   : > { %1980 = vmatpush1.bf16.msra.mxu0 %v1974_v19  ;;  %v3756_v19 = vld [vmem:[%s4804_s9 + $0x28] sm:$0xff]  }
 0x3b6   : > { %2133 = vmatprep.subr.bf16.mxu0 %v3831_v2 }
 0x3b8   : > { %3206 = vmatmul.mubr.msk.bf16.vlgmr.msra.gmra.mrb[12].mxu0 %vm1968_vm6, %v1965_v5  ;;  %v3757_v5 = vld [vmem:[%s4804_s9 + $0x30] sm:$0xff]  }
 0x3b9   : > { %2134 = vmatpush1.bf16.msra.mxu0 %v3701_v6  ;;  %v3758_v6 = vld [vmem:[%s4804_s9 + $0x38] sm:$0xff]  }
 0x3ba   : > { %2135 = vmatprep.subr.bf16.mxu0 %v3831_v2 }
 0x3bd   : > { %2136 = vmatpush1.bf16.msra.mxu0 %v3703_v8 }
 0x3be   : > { %2137 = vmatprep.subr.bf16.mxu0 %v3831_v2 }
 0x3c1   : > { %2138 = vmatpush1.bf16.msra.mxu0 %v3705_v20 }
 0x3c2   : > { %2139 = vmatprep.subr.bf16.mxu0 %v3831_v2 }
 0x3c5   : > { %2140 = vmatpush1.bf16.msra.mxu0 %v3707_v21 }
 0x3c6   : > { %2141 = vmatprep.subr.bf16.mxu0 %v3831_v2 }
 0x3c9   : > { %2142 = vmatpush1.bf16.msra.mxu0 %v3709_v22 }
 0x3ca   : > { %2143 = vmatprep.subr.bf16.mxu0 %v3831_v2 }
 0x3cd   : > { %2144 = vmatpush1.bf16.msra.mxu0 %v3711_v23 }
 0x3ce   : > { %2145 = vmatprep.subr.bf16.mxu0 %v3831_v2 }
 0x3d1   : > { %2146 = vmatpush1.bf16.msra.mxu0 %v3713_v24 }
 0x3d2   : > { %2147 = vmatprep.subr.bf16.mxu0 %v3831_v2 }
 0x3d5   : > { %2148 = vmatpush1.bf16.msra.mxu0 %v3715_v25 }
 0x3d6   : > { %2149 = vmatprep.subr.bf16.mxu0 %v3831_v2 }
 0x3d9   : > { %2150 = vmatpush1.bf16.msra.mxu0 %v3717_v26 }
 0x3da   : > { %2151 = vmatprep.subr.bf16.mxu0 %v3831_v2 }
 0x3dd   : > { %2152 = vmatpush1.bf16.msra.mxu0 %v3719_v28  ;;  %v3760_v28 = vld [vmem:[%s4806_s11 + $0x8] sm:$0xff]  }
 0x3de   : > { %2235 = vmatprep.subr.bf16.mxu0 %v3831_v2 }
 0x48b   : > { %v2013_v30 = vpop.f32.mrb[12].mxu0 }
 0x48c   : > { %v4529_v31 = vpack.c.bf16 %v2013_v30, %v2013_v30  ;;  %v2015_v32 = vpop.f32.mrb[13].mxu0  ;;  %v3762_v30 = vld [vmem:[%s4806_s11 + $0x18] sm:$0xff]  }
 0x48d   : > { %v4531_v33 = vpack.c.bf16 %v2015_v32, %v2015_v32  ;;  %v2017_v55 = vpop.f32.mrb[14].mxu0  ;;  %v3764_v32 = vld [vmem:[%s4806_s11 + $0x28] sm:$0xff]  }
 0x48e   : > { %v2018_v61 = vpop.f32.mrb[15].mxu0  ;;  %v2064_v35 = vshrl.u32 %v4529_v31, 16  ;;  %v2554_v36 = vrot.slane %v4529_v31, 2  ;;  %v2298_v59 = vrot.slane %v4529_v31, 1 }
 0x48f   : > { %v2067_v62 = vshrl.u32 %v4531_v33, 16  ;;  %v2555_v3 = vrot.slane %v4531_v33, 2  ;;  %v2299_v47 = vrot.slane %v4531_v33, 1 }
 0x490   : > { %v2426_v13 = vrot.slane %v2064_v35, 1 }
 0x491   : > { %3237 = vmatprep.mubr.msk.bf16.mxu0 %vm480_vm0, %v2067_v62  ;;  %3341 = vmatprep.mubr.msk.bf16.mxu1 %vm480_vm0, %v2555_v3  ;;  %v2427_v60 = vrot.slane %v2067_v62, 1 }
 0x492   : > { %2166 = vmatmul.mubr.bf16.vlgmr.msra.gmra.mrb[16].mxu0 %v2064_v35  ;;  %2653 = vmatmul.mubr.bf16.vlgmr.msra.gmra.mrb[4].mxu1 %v2554_v36 }
 0x493   : > { %2236 = vmatpush1.bf16.msra.mxu0 %v3721_v34  ;;  %3248 = vmatprep.mubr.msk.bf16.mxu0 %vm480_vm0, %v4531_v33 }
 0x494   : > { %2237 = vmatprep.subr.bf16.mxu0 %v3831_v2  ;;  %3416 = vmatprep.mubr.msk.bf16.mxu1 %vm3833_vm7, %v3832_v15 }
 0x495   : > { %3401 = vmatpush3.bf16.msra.mxu1 %v3759_v27 }
 0x496   : > { %3402 = vmatprep.subr.bf16.mxu1 %v3832_v15 }
 0x497   : > { %2238 = vmatpush1.bf16.msra.mxu0 %v3722_v37 }
 0x498   : > { %2239 = vmatprep.subr.bf16.mxu0 %v3831_v2 }
 0x499   : > { %3403 = vmatpush3.bf16.msra.mxu1 %v3760_v28 }
 0x49a   : > { %3404 = vmatprep.subr.bf16.mxu1 %v3832_v15 }
 0x49b   : > { %2240 = vmatpush1.bf16.msra.mxu0 %v3723_v38 }
 0x49c   : > { %2241 = vmatprep.subr.bf16.mxu0 %v3831_v2 }
 0x49d   : > { %3405 = vmatpush3.bf16.msra.mxu1 %v3761_v29 }
 0x49e   : > { %3406 = vmatprep.subr.bf16.mxu1 %v3832_v15 }
 0x49f   : > { %2242 = vmatpush1.bf16.msra.mxu0 %v3724_v39 }
 0x4a0   : > { %2243 = vmatprep.subr.bf16.mxu0 %v3831_v2 }
 0x4a1   : > { %3407 = vmatpush3.bf16.msra.mxu1 %v3762_v30 }
 0x4a2   : > { %3408 = vmatprep.subr.bf16.mxu1 %v3832_v15 }
 0x4a3   : > { %2244 = vmatpush1.bf16.msra.mxu0 %v3725_v40 }
 0x4a4   : > { %2245 = vmatprep.subr.bf16.mxu0 %v3831_v2 }
 0x4a7   : > { %2246 = vmatpush1.bf16.msra.mxu0 %v3726_v41 }
 0x4a8   : > { %2247 = vmatprep.subr.bf16.mxu0 %v3831_v2 }
 0x4ab   : > { %2248 = vmatpush1.bf16.msra.mxu0 %v3727_v42  ;;  %v2661_v42 = vld [vmem:[%s4803_s8] sm:$0x1] }
 0x4ac   : > { %2249 = vmatprep.subr.bf16.mxu0 %v3831_v2 }
 0x4af   : > { %2250 = vmatpush1.bf16.msra.mxu0 %v3728_v43 }
 0x4b0   : > { %2251 = vmatprep.subr.bf16.mxu0 %v3831_v2 }
 0x4b3   : > { %2252 = vmatpush1.bf16.msra.mxu0 %v3729_v44 }
 0x4b4   : > { %2253 = vmatprep.subr.bf16.mxu0 %v3831_v2 }
 0x4b7   : > { %2254 = vmatpush1.bf16.msra.mxu0 %v3730_v45 }
 0x4b8   : > { %2364 = vmatprep.subr.bf16.mxu0 %v3831_v2 }
 0x4ba   : > { %2268 = vmatmul.mubr.bf16.vlgmr.msra.gmra.mrb[20].mxu0 %v4529_v31  ;;  %v3763_v31 = vld [vmem:[%s4806_s11 + $0x20] sm:$0xff]  }
 0x4bb   : > { %2365 = vmatpush1.bf16.msra.mxu0 %v3731_v46  ;;  %3279 = vmatprep.mubr.msk.bf16.mxu0 %vm480_vm0, %v2299_v47 }
 0x4bc   : > { %2366 = vmatprep.subr.bf16.mxu0 %v3831_v2  ;;  %3409 = vmatpush3.bf16.msra.mxu1 %v3763_v31 }
 0x4bd   : > { %3410 = vmatprep.subr.bf16.mxu1 %v3832_v15 }
 0x4bf   : > { %2367 = vmatpush1.bf16.msra.mxu0 %v3732_v48 }
 0x4c0   : > { %2368 = vmatprep.subr.bf16.mxu0 %v3831_v2  ;;  %3411 = vmatpush3.bf16.msra.mxu1 %v3764_v32 }
 0x4c1   : > { %3412 = vmatprep.subr.bf16.mxu1 %v3832_v15 }
 0x4c3   : > { %2369 = vmatpush1.bf16.msra.mxu0 %v3733_v49  ;;  %v3765_v49 = vld [vmem:[%s4806_s11 + $0x30] sm:$0xff]  }
 0x4c4   : > { %2370 = vmatprep.subr.bf16.mxu0 %v3831_v2  ;;  %3413 = vmatpush3.bf16.msra.mxu1 %v3765_v49 }
 0x4c5   : > { %3414 = vmatprep.subr.bf16.mxu1 %v3832_v15 }
 0x4c7   : > { %2371 = vmatpush1.bf16.msra.mxu0 %v3734_v50  ;;  %v3766_v50 = vld [vmem:[%s4806_s11 + $0x38] sm:$0xff]  }
 0x4c8   : > { %2372 = vmatprep.subr.bf16.mxu0 %v3831_v2  ;;  %3415 = vmatpush3.bf16.msra.mxu1 %v3766_v50 }
 0x4cb   : > { %2373 = vmatpush1.bf16.msra.mxu0 %v3735_v51  ;;  %v2681_v51 = vld [vmem:[%s4805_s10] sm:$0x1] }
 0x4cc   : > { %2374 = vmatprep.subr.bf16.mxu0 %v3831_v2 }
 0x4cf   : > { %2375 = vmatpush1.bf16.msra.mxu0 %v3736_v53 }
 0x4d0   : > { %2376 = vmatprep.subr.bf16.mxu0 %v3831_v2 }
 0x4d3   : > { %2377 = vmatpush1.bf16.msra.mxu0 %v3737_v52 }
 0x4d4   : > { %2378 = vmatprep.subr.bf16.mxu0 %v3831_v2 }
 0x4d7   : > { %2379 = vmatpush1.bf16.msra.mxu0 %v3738_v54 }
 0x4d8   : > { %2380 = vmatprep.subr.bf16.mxu0 %v3831_v2 }
 0x4db   : > { %2381 = vmatpush1.bf16.msra.mxu0 %v3739_v56 }
 0x4dc   : > { %2382 = vmatprep.subr.bf16.mxu0 %v3831_v2 }
 0x4df   : > { %2383 = vmatpush1.bf16.msra.mxu0 %v3740_v57 }
 0x4e0   : > { %2492 = vmatprep.subr.bf16.mxu0 %v3831_v2 }
 0x4e2   : > { %2397 = vmatmul.mubr.bf16.vlgmr.msra.gmra.mrb[24].mxu0 %v2298_v59 }
 0x4e3   : > { %2493 = vmatpush1.bf16.msra.mxu0 %v3741_v58  ;;  %3310 = vmatprep.mubr.msk.bf16.mxu0 %vm480_vm0, %v2427_v60  ;;  %v2788_v60 = vld [vmem:[%s4807_s12] sm:$0x1] }
 0x4e4   : > { %2494 = vmatprep.subr.bf16.mxu0 %v3831_v2 }
 0x4e7   : > { %2495 = vmatpush1.bf16.msra.mxu0 %v3742_v63 }
 0x4e8   : > { %2496 = vmatprep.subr.bf16.mxu0 %v3831_v2 }
 0x4eb   : > { %2497 = vmatpush1.bf16.msra.mxu0 %v3743_v4 }
 0x4ec   : > { %2498 = vmatprep.subr.bf16.mxu0 %v3831_v2 }
 0x4ef   : > { %2499 = vmatpush1.bf16.msra.mxu0 %v3744_v7 }
 0x4f0   : > { %2500 = vmatprep.subr.bf16.mxu0 %v3831_v2 }
 0x4f3   : > { %2501 = vmatpush1.bf16.msra.mxu0 %v3745_v10 }
 0x4f4   : > { %2502 = vmatprep.subr.bf16.mxu0 %v3831_v2 }
 0x4f7   : > { %2503 = vmatpush1.bf16.msra.mxu0 %v3746_v11 }
 0x4f8   : > { %2504 = vmatprep.subr.bf16.mxu0 %v3831_v2 }
 0x4fb   : > { %2505 = vmatpush1.bf16.msra.mxu0 %v3747_v12 }
 0x4fc   : > { %2506 = vmatprep.subr.bf16.mxu0 %v3831_v2 }
 0x4ff   : > { %2507 = vmatpush1.bf16.msra.mxu0 %v3748_v0 }
 0x500   : > { %2508 = vmatprep.subr.bf16.mxu0 %v3831_v2 }
 0x503   : > { %2509 = vmatpush1.bf16.msra.mxu0 %v3749_v1 }
 0x504   : > { %2510 = vmatprep.subr.bf16.mxu0 %v3831_v2  ;;  %v3753_v2 = vld [vmem:[%s4804_s9 + $0x10] sm:$0xff]  }
 0x507   : > { %2511 = vmatpush1.bf16.msra.mxu0 %v3750_v9 }
 0x508   : > { %3380 = vmatprep.subr.bf16.mxu0 %v3832_v15 }
 0x50a   : > { %2525 = vmatmul.mubr.bf16.vlgmr.msra.gmra.mrb[28].mxu0 %v2426_v13 }
 0x50b   : > { %3381 = vmatpush3.bf16.msra.mxu0 %v3751_v14  ;;  %3396 = vmatprep.mubr.msk.bf16.mxu0 %vm3833_vm7, %v3832_v15 }
 0x50c   : > { %3382 = vmatprep.subr.bf16.mxu0 %v3832_v15 }
 0x50f   : > { %3383 = vmatpush3.bf16.msra.mxu0 %v3752_v16 }
 0x510   : > { %3384 = vmatprep.subr.bf16.mxu0 %v3832_v15 }
 0x513   : > { %3385 = vmatpush3.bf16.msra.mxu0 %v3753_v2 }
 0x514   : > { %3386 = vmatprep.subr.bf16.mxu0 %v3832_v15 }
 0x517   : > { %3387 = vmatpush3.bf16.msra.mxu0 %v3754_v17 }
 0x518   : > { %3388 = vmatprep.subr.bf16.mxu0 %v3832_v15 }
 0x51b   : > { %3389 = vmatpush3.bf16.msra.mxu0 %v3755_v18 }
 0x51c   : > { %3390 = vmatprep.subr.bf16.mxu0 %v3832_v15 }
 0x51f   : > { %3391 = vmatpush3.bf16.msra.mxu0 %v3756_v19 }
 0x520   : > { %3392 = vmatprep.subr.bf16.mxu0 %v3832_v15 }
 0x523   : > { %3393 = vmatpush3.bf16.msra.mxu0 %v3757_v5 }
 0x524   : > { %3394 = vmatprep.subr.bf16.mxu0 %v3832_v15 }
 0x527   : > { %3395 = vmatpush3.bf16.msra.mxu0 %v3758_v6 }
 0x565   : > { %v2167_v8 = vpop.f32.mrb[16].mxu0  ;;  %v2654_v20 = vpop.f32.mrb[4].mxu1 }
 0x566   : > { %v2169_v21 = vpop.f32.mrb[17].mxu0  ;;  %v2656_v22 = vpop.f32.mrb[5].mxu1 }
 0x567   : > { %v2170_v23 = vpop.f32.mrb[18].mxu0  ;;  %v2657_v24 = vpop.f32.mrb[6].mxu1 }
 0x568   : > { %v2171_v25 = vpop.f32.mrb[19].mxu0  ;;  %v2658_v26 = vpop.f32.mrb[7].mxu1 }
 0x58d   : > { %v2269_v33 = vpop.f32.mrb[20].mxu0 }
 0x58e   : > { %v2270_v55 = vadd.f32 %v2269_v33, %v2167_v8  ;;  %v2271_v61 = vpop.f32.mrb[21].mxu0 }
 0x58f   : > { %v2272_v62 = vpop.f32.mrb[22].mxu0 }
 0x590   : > { %v2273_v3 = vpop.f32.mrb[23].mxu0 }
 0x5b5   : > { %v2398_v34 = vpop.f32.mrb[24].mxu0 }
 0x5b6   : > { %v2404_v35 = vadd.f32 %v2398_v34, %v2270_v55  ;;  %v2400_v36 = vpop.f32.mrb[25].mxu0 }
 0x5b7   : > { %v2401_v37 = vpop.f32.mrb[26].mxu0 }
 0x5b8   : > { %v2402_v38 = vpop.f32.mrb[27].mxu0 }
 0x5dd   : > { %v2526_v39 = vpop.f32.mrb[28].mxu0 }
 0x5de   : > { %v2532_v40 = vadd.f32 %v2526_v39, %v2404_v35  ;;  %v2528_v41 = vpop.f32.mrb[29].mxu0 }
 0x5df   : > { %v2529_v43 = vpop.f32.mrb[30].mxu0 }
 0x5e0   : > { %v2660_v44 = vadd.f32 %v2654_v20, %v2532_v40  ;;  %v2530_v45 = vpop.f32.mrb[31].mxu0 }
 0x5e2   : > { %v2662_v46 = vadd.f32 %v2661_v42, %v2660_v44 }
 0x5e4   : > { %v2663_v47 = vmax.f32 %v2662_v46, 0.0 }
 0x5e6   : > { %v2664_v48 = vpack.c.bf16 %v2663_v47, %v2663_v47 }
 0x5e8   : > { %3397 = vmatmul.mubr.bf16.vlgmr.msra.gmra.mrb[32].mxu0 %v2664_v48 }
 0x6bb   : > { %v2764_v53 = vpop.f32.mrb[32].mxu0 }
 0x6bc   : > { %v2765_v52 = vadd.f32 %v2764_v53, %v2681_v51  ;;  %v3398_v54 = vpop.f32.mrb[33].mxu0 }
 0x6bd   : > { %v2767_v56 = vpop.f32.mrb[34].mxu0 }
 0x6be   : > { %v2770_v57 = vmax.f32 %v2765_v52, 0.0  ;;  %v3399_v58 = vpop.f32.mrb[35].mxu0 }
 0x6c0   : > { %v2771_v59 = vpack.c.bf16 %v2770_v57, %v2770_v57 }
 0x6c2   : > { %3417 = vmatmul.mubr.bf16.vlgmr.msra.gmra.mrb[8].mxu1 %v2771_v59 }
 0x795   : > { %v2871_v63 = vpop.f32.mrb[8].mxu1 }
 0x796   : > { %v2872_v4 = vadd.f32 %v2871_v63, %v2788_v60  ;;  %v3418_v7 = vpop.f32.mrb[9].mxu1 }
 0x797   : > { %v2874_v10 = vpop.f32.mrb[10].mxu1 }
 0x798   : > { %2877 = vst [vmem:[%s432_s14] sm:$0x1] %v2872_v4  ;;  %v3419_v11 = vpop.f32.mrb[11].mxu1 }
 0x799   : > { %3780 = shalt.err (!%p3777_p3)
}
 0x79a   : > { %s3781_s27 = scalar_lea.hbm %s4753_s23, 16  ;;  %s3785_s21 = scalar_lea.hbm %s4808_s13, 32 }
 0x79b   : > { %p3782_p4 = scmp.ne.s32.totalorder %s4753_s23, %s3781_s27  ;;  %p3786_p9 = scmp.lt.u32.totalorder %s4753_s23, %s4808_s13 }
 0x79c   : > { %p3787_p10 = scmp.lt.u32.totalorder %s3785_s21, %s3781_s27  ;;  %p3789_p12 = scmp.lt.u32.totalorder %s3781_s27, %s4753_s23 }
 0x79d   : > { %p3783_p7 = pnand %p3782_p4, %p3943_p5 }
 0x79e   : > { %p3788_p11 = por %p3787_p10, %p3786_p9 }
 0x79f   : > { %p3784_p8 = pneg %p3783_p7 }
 0x7a0   : > { %p3790_p13 = por %p3789_p12, %p3788_p11 }
 0x7a2   : > { %p3791_p0 = pnand %p3790_p13, %p3784_p8 }
 0x7a4   : > { %3794 = shalt.err (!%p3791_p0)
}
 0x7a5   : > { %3468 = dma.vmem_to_hbm [thread:$0]  (%p3943_p5), %s4755_s20, 16, %s4753_s23, %s2879_s24  }
 0x7a6 PF: > { %p3474_p1 = scmp.ge.s32.totalorder %s3829_s28, 2  ;;  %s2903_s29 = sand.u32 1, %s3817_s25  }
 0x7a7   : > { %s2904_s17 = scalar_lea.sflag [#allocation3], %s2903_s29 }
 0x7a8   : > { %p3471_p2 = pnand %p3474_p1, %p3947_p6 }
 0x7aa   : > { %3812 = dma.done.wait (!%p3471_p2), %s2904_s17, 16  }
 0x7ab   : > { %3814 = vsyncadd (!%p3471_p2), %s2904_s17, 4294967280  ;;  %s4817_s28 = sld [smem:[#allocation6_spill]]  ;;  %s4818_s15 = sld [smem:[#allocation5_spill]] }
 0x7ac   : > { %s4819_s27 = sld [smem:[#allocation7_spill]]  ;;  %s4820_s25 = smov %s3821_s26 }
 0x7b1   : > { %p23_p3 = scmp.ge.s32.totalorder %s4817_s28, 4   ;;  %s4821_s26 = smov %s4818_s15 }
 0x7b3   :  { %25 = sbr.rel (!%p23_p3) target bundleno = 3 (0x3), region = 119 }
 0x7ba   :  { %2908 = vsyncpa [#allocation3], 1 }
 0x7bb   :  { %2910 = vsyncpa [#allocation3 + $0x1], 1 }

</bundles_post_ra>
